<compile_context>
chip_gen: v6e
topology: v6e:2x2x1
jax: 0.10.0
libtpu: 0.0.40
codegen_flags: <defaults>
</compile_context>

<pallas_src>
import functools

import jax
import jax.numpy as jnp
from jax import lax
from jax.experimental import pallas as pl
from jax.experimental.pallas import tpu as pltpu


def _dcam_kernel(qf_ref, kv_ref, vres_ref, wq_ref, wkv_ref, o_ref,
                 q_sc, m_sc, l_sc, acc_sc, *, mid, hw, tk, needs_mask):
    ki = pl.program_id(2)

    @pl.when(ki == 0)
    def _init():
        m_sc[...] = jnp.full_like(m_sc, -jnp.inf)
        l_sc[...] = jnp.zeros_like(l_sc)
        acc_sc[...] = jnp.zeros_like(acc_sc)
        # q = Wq @ feature_q depends only on (b, qi): hoist it out of the KV
        # reduction loop (computed once, reused for every ki step).
        q = jnp.dot(wq_ref[...], qf_ref[0],
                    preferred_element_type=jnp.float32)            # (mid, TQ)
        q_sc[...] = q.astype(jnp.bfloat16)

    # Fused key/value projection: wkv = block_diag(wk, wv), so a single bf16
    # MXU dot yields k (rows [:mid]) and v (rows [mid:]) for this KV tile.
    kv_proj = jnp.dot(wkv_ref[...], kv_ref[0],
                      preferred_element_type=jnp.float32)           # (mid+Cv, TK)
    k = kv_proj[:mid].astype(jnp.bfloat16)                          # (mid, TK)
    v = kv_proj[mid:].astype(jnp.bfloat16)                          # (Cv, TK)

    # Transposed scores: s_T[j, i] = sum_m k[m, j] * q[m, i]  -> (TK, TQ).
    # dim0-vs-dim0 contraction: no XLU transpose of a score tile needed.
    s_t = lax.dot_general(k, q_sc[...], (((0,), (0,)), ((), ())),
                          preferred_element_type=jnp.float32)       # (TK, TQ)

    if needs_mask:
        # Zero-padded key columns must not contribute to softmax.
        key_idx = ki * tk + lax.broadcasted_iota(jnp.int32, s_t.shape, 0)
        s_t = jnp.where(key_idx < hw, s_t, -jnp.inf)

    # Online softmax over the KV axis (axis 0 of s_t); math in f32.
    m_prev = m_sc[...]                                              # (1, TQ)
    m_new = jnp.maximum(m_prev, jnp.max(s_t, axis=0, keepdims=True))
    alpha = jnp.exp(m_prev - m_new)                                 # (1, TQ)
    p_t = jnp.exp(s_t - m_new)                                      # (TK, TQ)
    l_sc[...] = alpha * l_sc[...] + jnp.sum(p_t, axis=0, keepdims=True)

    # Un-normalized output accumulate: canonical (Cv, TK) x (TK, TQ) MXU dot.
    acc_sc[...] = alpha * acc_sc[...] + lax.dot_general(
        v, p_t.astype(jnp.bfloat16), (((1,), (0,)), ((), ())),
        preferred_element_type=jnp.float32)                         # (Cv, TQ)
    m_sc[...] = m_new

    @pl.when(ki == pl.num_programs(2) - 1)
    def _finalize():
        # One per-query EUP reciprocal + broadcast multiply, then the f32
        # residual add of feature_v at the query tile.
        inv_l = pl.reciprocal(l_sc[...], approx=True)               # (1, TQ)
        o_ref[0] = (acc_sc[...] * inv_l + vres_ref[0]).astype(o_ref.dtype)


def dcam_forward(feature_q, feature_k, feature_v, wq, wk, wv):
    """feature_*: NCHW float32. wq: (mid, Cq), wk: (mid, Ck), wv: (Cv, Cv)."""
    B, Cq, H, W = feature_q.shape
    _, Ck, _, _ = feature_k.shape
    _, Cv, _, _ = feature_v.shape
    HW = H * W
    mid = wq.shape[0]

    # 256-wide tiles match the v6e/v7x 256^2 MXU and give lane-dense stores;
    # small feature maps use 128 so zero-padding overhead stays bounded.
    tile = 256 if HW >= 256 else 128
    hw_pad = int(pl.cdiv(HW, tile)) * tile
    pad = hw_pad - HW

    qf = feature_q.reshape(B, Cq, HW)
    kf = feature_k.reshape(B, Ck, HW)
    vf = feature_v.reshape(B, Cv, HW)
    if pad:
        qf = jnp.pad(qf, ((0, 0), (0, 0), (0, pad)))
        kf = jnp.pad(kf, ((0, 0), (0, 0), (0, pad)))
        vf = jnp.pad(vf, ((0, 0), (0, 0), (0, pad)))

    # Single KV-side feature stream (one DMA per inner step), bf16 for the MXU.
    kv_bf = jnp.concatenate([kf, vf], axis=1).astype(jnp.bfloat16)  # (B, Ck+Cv, HWp)
    qf_bf = qf.astype(jnp.bfloat16)
    wq_bf = wq.astype(jnp.bfloat16)
    # Block-diagonal fused key/value projection weight (mid+Cv, Ck+Cv).
    wkv = jnp.zeros((mid + Cv, Ck + Cv), wk.dtype)
    wkv = wkv.at[:mid, :Ck].set(wk).at[mid:, Ck:].set(wv)
    wkv_bf = wkv.astype(jnp.bfloat16)

    ckv = Ck + Cv
    n_tiles = hw_pad // tile

    flops = int(2 * B * hw_pad * hw_pad * (mid + Cv)
                + 2 * B * hw_pad * (mid * Cq + (mid + Cv) * ckv))
    transcendentals = int(B * hw_pad * hw_pad + B * hw_pad)
    bytes_accessed = int(2 * (qf_bf.size + kv_bf.size + wq_bf.size + wkv_bf.size)
                         + 4 * (vf.size + B * Cv * hw_pad))

    # Explicit VMEM budget derived from the tiling (double-buffered tiles +
    # scratch + score temporaries, with headroom). Fits every generation
    # (v5e 16 MiB scoped default / v7x 64 MiB physical).
    tile_bytes = (2 * (Cq * tile * 2 + ckv * tile * 2 + Cv * tile * 4)  # inputs
                  + 2 * Cv * tile * 4                                    # output
                  + mid * tile * 2 + 2 * tile * 4 + Cv * tile * 4        # scratch
                  + 8 * tile * tile * 4                                  # s_t/p_t temps
                  + 2 * (wq.size + wkv.size))
    vmem_limit = int(min(max(4 * tile_bytes, 16 * 1024 * 1024), 32 * 1024 * 1024))

    kernel = functools.partial(_dcam_kernel, mid=mid, hw=HW, tk=tile,
                               needs_mask=(pad > 0))

    out = pl.pallas_call(
        kernel,
        out_shape=jax.ShapeDtypeStruct((B, Cv, hw_pad), feature_v.dtype),
        grid_spec=pltpu.PrefetchScalarGridSpec(
            num_scalar_prefetch=0,
            grid=(B, n_tiles, n_tiles),
            in_specs=[
                # query features at the query tile (bf16, for the projection)
                pl.BlockSpec((1, Cq, tile), lambda b, qi, ki: (b, 0, qi)),
                # concatenated key+value features at the KV tile (bf16)
                pl.BlockSpec((1, ckv, tile), lambda b, qi, ki: (b, 0, ki)),
                # value features at the query tile (f32 residual add)
                pl.BlockSpec((1, Cv, tile), lambda b, qi, ki: (b, 0, qi)),
                # 1x1 conv weights (whole, grid-invariant -> fetched once)
                pl.BlockSpec((mid, Cq), lambda b, qi, ki: (0, 0)),
                pl.BlockSpec((mid + Cv, ckv), lambda b, qi, ki: (0, 0)),
            ],
            out_specs=pl.BlockSpec((1, Cv, tile), lambda b, qi, ki: (b, 0, qi)),
            scratch_shapes=[
                pltpu.VMEM((mid, tile), jnp.bfloat16),   # hoisted q projection
                pltpu.VMEM((1, tile), jnp.float32),      # running max m
                pltpu.VMEM((1, tile), jnp.float32),      # running denom l
                pltpu.VMEM((Cv, tile), jnp.float32),     # un-normalized out acc
            ],
        ),
        compiler_params=pltpu.CompilerParams(
            dimension_semantics=("parallel", "parallel", "arbitrary"),
            vmem_limit_bytes=vmem_limit,
        ),
        cost_estimate=pl.CostEstimate(
            flops=flops,
            transcendentals=transcendentals,
            bytes_accessed=bytes_accessed,
        ),
    )(qf_bf, kv_bf, vf, wq_bf, wkv_bf)

    return out[:, :, :HW].reshape(B, Cv, H, W)


def dcam_reference(feature_q, feature_k, feature_v, wq, wk, wv):
    """Plain-JAX f32 reference mirroring the PyTorch forward (down_scale=1)."""
    B, Cv, H, W = feature_v.shape
    HW = H * W
    q = jnp.einsum('mc,bcs->bms', wq, feature_q.reshape(B, -1, HW))   # (B, mid, HW)
    k = jnp.einsum('mc,bcs->bms', wk, feature_k.reshape(B, -1, HW))   # (B, mid, HW)
    v = jnp.einsum('dc,bcs->bds', wv, feature_v.reshape(B, Cv, HW))   # (B, Cv, HW)
    s = jnp.einsum('bmi,bmj->bij', q, k)                              # (B, HW, HW)
    a = jax.nn.softmax(s, axis=-1)
    o = jnp.einsum('bcj,bij->bci', v, a)                              # (B, Cv, HW)
    return o.reshape(B, Cv, H, W) + feature_v


if __name__ == "__main__":
    def _check(B, Cq, Ck, Cv, H, W, MID):
        key = jax.random.PRNGKey(0)
        kq, kk, kv, kwq, kwk, kwv = jax.random.split(key, 6)
        feature_q = jax.random.normal(kq, (B, Cq, H, W), dtype=jnp.float32)
        feature_k = jax.random.normal(kk, (B, Ck, H, W), dtype=jnp.float32)
        feature_v = jax.random.normal(kv, (B, Cv, H, W), dtype=jnp.float32)
        # 1x1 conv weights (Conv2d weight (out, in, 1, 1) squeezed to (out, in)).
        wq = 0.1 * jax.random.normal(kwq, (MID, Cq), dtype=jnp.float32)
        wk = 0.1 * jax.random.normal(kwk, (MID, Ck), dtype=jnp.float32)
        wv = 0.1 * jax.random.normal(kwv, (Cv, Cv), dtype=jnp.float32)

        out = jax.block_until_ready(
            dcam_forward(feature_q, feature_k, feature_v, wq, wk, wv))
        ref = dcam_reference(feature_q, feature_k, feature_v, wq, wk, wv)
        assert out.shape == (B, Cv, H, W)
        # bf16 MXU operands + approx reciprocal vs f32 reference -> bf16-level tol.
        err = float(jnp.max(jnp.abs(out - ref)))
        assert jnp.allclose(out, ref, atol=2e-2, rtol=2e-2), (
            f"mismatch vs reference at {(B, Cq, Ck, Cv, H, W, MID)}: max err {err}")

    # Default DCAM config (q_planes=k_planes=v_planes=4, mid_planes=32,
    # down_scale=1), small deterministic shapes.
    _check(B=2, Cq=4, Ck=4, Cv=4, H=16, W=16, MID=32)   # HW=256: exact tile fit
    _check(B=1, Cq=4, Ck=4, Cv=4, H=10, W=12, MID=32)   # HW=120: padded + masked
    _check(B=2, Cq=4, Ck=4, Cv=4, H=32, W=32, MID=32)   # HW=1024: multi KV-tile loop

    print("KERNEL_OK")
</pallas_src>

<mosaic_0001>
module attributes {stable_mosaic.version = 11 : i64} {
  func.func @_dcam_kernel(%arg0: i32, %arg1: i32, %arg2: i32, %arg3: memref<1x4x256xbf16, #tpu.memory_space<vmem>>, %arg4: memref<1x8x256xbf16, #tpu.memory_space<vmem>>, %arg5: memref<1x4x256xf32, #tpu.memory_space<vmem>>, %arg6: memref<32x4xbf16, #tpu.memory_space<vmem>>, %arg7: memref<36x8xbf16, #tpu.memory_space<vmem>>, %arg8: memref<1x4x256xf32, #tpu.memory_space<vmem>>, %arg9: memref<32x256xbf16, #tpu.memory_space<vmem>>, %arg10: memref<1x256xf32, #tpu.memory_space<vmem>>, %arg11: memref<1x256xf32, #tpu.memory_space<vmem>>, %arg12: memref<4x256xf32, #tpu.memory_space<vmem>>) attributes {dimension_semantics = [#tpu.dimension_semantics<parallel>, #tpu.dimension_semantics<parallel>, #tpu.dimension_semantics<arbitrary>], iteration_bounds = array<i64: 2, 1, 1>, scalar_prefetch = 0 : i64, scratch_operands = 4 : i64, tpu.core_type = #tpu.core_type<tc>, window_params = [{transform_indices = @transform_0, window_bounds = array<i64: 1, 4, 256>}, {transform_indices = @transform_1, window_bounds = array<i64: 1, 8, 256>}, {transform_indices = @transform_2, window_bounds = array<i64: 1, 4, 256>}, {pipeline_mode = #tpu.pipeline_mode<synchronous>, transform_indices = @transform_3, window_bounds = array<i64: 32, 4>}, {pipeline_mode = #tpu.pipeline_mode<synchronous>, transform_indices = @transform_4, window_bounds = array<i64: 36, 8>}, {transform_indices = @transform_5, window_bounds = array<i64: 1, 4, 256>}]} {
    %c0_i32 = arith.constant 0 : i32
    %0 = arith.cmpi eq, %arg2, %c0_i32 : i32
    %1 = arith.extui %0 : i1 to i32
    %c0_i32_0 = arith.constant 0 : i32
    %2 = arith.cmpi ne, %1, %c0_i32_0 : i32
    scf.if %2 {
      %cst_25 = arith.constant 0xFF800000 : f32
      %39 = vector.broadcast %cst_25 : f32 to vector<1x256xf32>
      %c0_26 = arith.constant 0 : index
      %c0_27 = arith.constant 0 : index
      %40 = vector.load %arg10[%c0_26, %c0_27] : memref<1x256xf32, #tpu.memory_space<vmem>>, vector<1x256xf32>
      tpu.vector_store %arg10[%c0_26, %c0_27], %39 {strides = array<i32>} : memref<1x256xf32, #tpu.memory_space<vmem>>, vector<1x256xf32>,
      %cst_28 = arith.constant 0.000000e+00 : f32
      %41 = vector.broadcast %cst_28 : f32 to vector<1x256xf32>
      %c0_29 = arith.constant 0 : index
      %c0_30 = arith.constant 0 : index
      %42 = vector.load %arg11[%c0_29, %c0_30] : memref<1x256xf32, #tpu.memory_space<vmem>>, vector<1x256xf32>
      tpu.vector_store %arg11[%c0_29, %c0_30], %41 {strides = array<i32>} : memref<1x256xf32, #tpu.memory_space<vmem>>, vector<1x256xf32>,
      %cst_31 = arith.constant 0.000000e+00 : f32
      %43 = vector.broadcast %cst_31 : f32 to vector<4x256xf32>
      %c0_32 = arith.constant 0 : index
      %c0_33 = arith.constant 0 : index
      %44 = vector.load %arg12[%c0_32, %c0_33] : memref<4x256xf32, #tpu.memory_space<vmem>>, vector<4x256xf32>
      tpu.vector_store %arg12[%c0_32, %c0_33], %43 {strides = array<i32>} : memref<4x256xf32, #tpu.memory_space<vmem>>, vector<4x256xf32>,
      %c0_34 = arith.constant 0 : index
      %c0_35 = arith.constant 0 : index
      %45 = vector.load %arg6[%c0_34, %c0_35] : memref<32x4xbf16, #tpu.memory_space<vmem>>, vector<32x4xbf16>
      %c0_36 = arith.constant 0 : index
      %c0_37 = arith.constant 0 : index
      %c0_38 = arith.constant 0 : index
      %46 = vector.load %arg3[%c0_36, %c0_37, %c0_38] : memref<1x4x256xbf16, #tpu.memory_space<vmem>>, vector<1x4x256xbf16>
      %47 = vector.shape_cast %46 : vector<1x4x256xbf16> to vector<4x256xbf16>
      %cst_39 = arith.constant dense<0.000000e+00> : vector<32x256xf32>
      %48 = tpu.matmul %45, %47, %cst_39 {dimension_numbers = #tpu.dot_dimension_numbers<[1], [0], [0], [1], [0, 0, 1, 1], [], []>} : vector<32x4xbf16>, vector<4x256xbf16>, vector<32x256xf32> -> vector<32x256xf32>
      %49 = arith.truncf %48 : vector<32x256xf32> to vector<32x256xbf16>
      %c0_40 = arith.constant 0 : index
      %c0_41 = arith.constant 0 : index
      %50 = vector.load %arg9[%c0_40, %c0_41] : memref<32x256xbf16, #tpu.memory_space<vmem>>, vector<32x256xbf16>
      tpu.vector_store %arg9[%c0_40, %c0_41], %49 {strides = array<i32>} : memref<32x256xbf16, #tpu.memory_space<vmem>>, vector<32x256xbf16>,
    } else {
    }
    %c0 = arith.constant 0 : index
    %c0_1 = arith.constant 0 : index
    %3 = vector.load %arg7[%c0, %c0_1] : memref<36x8xbf16, #tpu.memory_space<vmem>>, vector<36x8xbf16>
    %c0_2 = arith.constant 0 : index
    %c0_3 = arith.constant 0 : index
    %c0_4 = arith.constant 0 : index
    %4 = vector.load %arg4[%c0_2, %c0_3, %c0_4] : memref<1x8x256xbf16, #tpu.memory_space<vmem>>, vector<1x8x256xbf16>
    %5 = vector.shape_cast %4 : vector<1x8x256xbf16> to vector<8x256xbf16>
    %cst = arith.constant dense<0.000000e+00> : vector<36x256xf32>
    %6 = tpu.matmul %3, %5, %cst {dimension_numbers = #tpu.dot_dimension_numbers<[1], [0], [0], [1], [0, 0, 1, 1], [], []>} : vector<36x8xbf16>, vector<8x256xbf16>, vector<36x256xf32> -> vector<36x256xf32>
    %7 = vector.extract_strided_slice %6 {offsets = [0, 0], sizes = [32, 256], strides = [1, 1]} : vector<36x256xf32> to vector<32x256xf32>
    %8 = arith.truncf %7 : vector<32x256xf32> to vector<32x256xbf16>
    %9 = vector.extract_strided_slice %6 {offsets = [32, 0], sizes = [4, 256], strides = [1, 1]} : vector<36x256xf32> to vector<4x256xf32>
    %10 = arith.truncf %9 : vector<4x256xf32> to vector<4x256xbf16>
    %c0_5 = arith.constant 0 : index
    %c0_6 = arith.constant 0 : index
    %11 = vector.load %arg9[%c0_5, %c0_6] : memref<32x256xbf16, #tpu.memory_space<vmem>>, vector<32x256xbf16>
    %cst_7 = arith.constant dense<0.000000e+00> : vector<256x256xf32>
    %12 = tpu.matmul %8, %11, %cst_7 {dimension_numbers = #tpu.dot_dimension_numbers<[0], [0], [1], [1], [0, 1, 1, 1], [], []>} : vector<32x256xbf16>, vector<32x256xbf16>, vector<256x256xf32> -> vector<256x256xf32>
    %c0_8 = arith.constant 0 : index
    %c0_9 = arith.constant 0 : index
    %13 = vector.load %arg10[%c0_8, %c0_9] : memref<1x256xf32, #tpu.memory_space<vmem>>, vector<1x256xf32>
    %cst_10 = arith.constant dense<0xFF800000> : vector<256xf32>
    %14 = vector.multi_reduction <maximumf>, %12, %cst_10 [0] : vector<256x256xf32> to vector<256xf32>
    %15 = vector.shape_cast %14 : vector<256xf32> to vector<1x256xf32>
    %16 = arith.maximumf %13, %15 : vector<1x256xf32>
    %17 = arith.subf %13, %16 : vector<1x256xf32>
    %18 = math.exp %17 : vector<1x256xf32>
    %19 = vector.broadcast %16 : vector<1x256xf32> to vector<256x256xf32>
    %20 = arith.subf %12, %19 : vector<256x256xf32>
    %21 = math.exp %20 : vector<256x256xf32>
    %c0_11 = arith.constant 0 : index
    %c0_12 = arith.constant 0 : index
    %22 = vector.load %arg11[%c0_11, %c0_12] : memref<1x256xf32, #tpu.memory_space<vmem>>, vector<1x256xf32>
    %23 = arith.mulf %18, %22 : vector<1x256xf32>
    %cst_13 = arith.constant dense<0.000000e+00> : vector<256xf32>
    %24 = vector.multi_reduction <add>, %21, %cst_13 [0] : vector<256x256xf32> to vector<256xf32>
    %25 = vector.shape_cast %24 : vector<256xf32> to vector<1x256xf32>
    %26 = arith.addf %23, %25 : vector<1x256xf32>
    %c0_14 = arith.constant 0 : index
    %c0_15 = arith.constant 0 : index
    %27 = vector.load %arg11[%c0_14, %c0_15] : memref<1x256xf32, #tpu.memory_space<vmem>>, vector<1x256xf32>
    tpu.vector_store %arg11[%c0_14, %c0_15], %26 {strides = array<i32>} : memref<1x256xf32, #tpu.memory_space<vmem>>, vector<1x256xf32>,
    %c0_16 = arith.constant 0 : index
    %c0_17 = arith.constant 0 : index
    %28 = vector.load %arg12[%c0_16, %c0_17] : memref<4x256xf32, #tpu.memory_space<vmem>>, vector<4x256xf32>
    %29 = vector.broadcast %18 : vector<1x256xf32> to vector<4x256xf32>
    %30 = arith.mulf %29, %28 : vector<4x256xf32>
    %31 = arith.truncf %21 : vector<256x256xf32> to vector<256x256xbf16>
    %cst_18 = arith.constant dense<0.000000e+00> : vector<4x256xf32>
    %32 = tpu.matmul %10, %31, %cst_18 {dimension_numbers = #tpu.dot_dimension_numbers<[1], [0], [0], [1], [0, 0, 1, 1], [], []>} : vector<4x256xbf16>, vector<256x256xbf16>, vector<4x256xf32> -> vector<4x256xf32>
    %33 = arith.addf %30, %32 : vector<4x256xf32>
    %c0_19 = arith.constant 0 : index
    %c0_20 = arith.constant 0 : index
    %34 = vector.load %arg12[%c0_19, %c0_20] : memref<4x256xf32, #tpu.memory_space<vmem>>, vector<4x256xf32>
    tpu.vector_store %arg12[%c0_19, %c0_20], %33 {strides = array<i32>} : memref<4x256xf32, #tpu.memory_space<vmem>>, vector<4x256xf32>,
    %c0_21 = arith.constant 0 : index
    %c0_22 = arith.constant 0 : index
    %35 = vector.load %arg10[%c0_21, %c0_22] : memref<1x256xf32, #tpu.memory_space<vmem>>, vector<1x256xf32>
    tpu.vector_store %arg10[%c0_21, %c0_22], %16 {strides = array<i32>} : memref<1x256xf32, #tpu.memory_space<vmem>>, vector<1x256xf32>,
    %c0_i32_23 = arith.constant 0 : i32
    %36 = arith.cmpi eq, %arg2, %c0_i32_23 : i32
    %37 = arith.extui %36 : i1 to i32
    %c0_i32_24 = arith.constant 0 : i32
    %38 = arith.cmpi ne, %37, %c0_i32_24 : i32
    scf.if %38 {
      %c0_25 = arith.constant 0 : index
      %c0_26 = arith.constant 0 : index
      %39 = vector.load %arg11[%c0_25, %c0_26] : memref<1x256xf32, #tpu.memory_space<vmem>>, vector<1x256xf32>
      %40 = tpu.reciprocal %39 {approx = true} : vector<1x256xf32> -> vector<1x256xf32>
      %c0_27 = arith.constant 0 : index
      %c0_28 = arith.constant 0 : index
      %41 = vector.load %arg12[%c0_27, %c0_28] : memref<4x256xf32, #tpu.memory_space<vmem>>, vector<4x256xf32>
      %42 = vector.broadcast %40 : vector<1x256xf32> to vector<4x256xf32>
      %43 = arith.mulf %41, %42 : vector<4x256xf32>
      %c0_29 = arith.constant 0 : index
      %c0_30 = arith.constant 0 : index
      %c0_31 = arith.constant 0 : index
      %44 = vector.load %arg5[%c0_29, %c0_30, %c0_31] : memref<1x4x256xf32, #tpu.memory_space<vmem>>, vector<1x4x256xf32>
      %45 = vector.shape_cast %44 : vector<1x4x256xf32> to vector<4x256xf32>
      %46 = arith.addf %43, %45 : vector<4x256xf32>
      %c0_32 = arith.constant 0 : index
      %c0_33 = arith.constant 0 : index
      %c0_34 = arith.constant 0 : index
      %47 = vector.load %arg8[%c0_32, %c0_33, %c0_34] : memref<1x4x256xf32, #tpu.memory_space<vmem>>, vector<1x4x256xf32>
      %48 = vector.shape_cast %47 : vector<1x4x256xf32> to vector<4x256xf32>
      %49 = vector.shape_cast %46 : vector<4x256xf32> to vector<1x4x256xf32>
      tpu.vector_store %arg8[%c0_32, %c0_33, %c0_34], %49 {strides = array<i32>} : memref<1x4x256xf32, #tpu.memory_space<vmem>>, vector<1x4x256xf32>,
    } else {
    }
    return
  }
  func.func @transform_0(%arg0: i32, %arg1: i32, %arg2: i32) -> (i32, i32, i32) {
    %c0_i32 = arith.constant 0 : i32
    %c0_i32_0 = arith.constant 0 : i32
    return %arg0, %c0_i32, %arg1 : i32, i32, i32
  }
  func.func @transform_1(%arg0: i32, %arg1: i32, %arg2: i32) -> (i32, i32, i32) {
    %c0_i32 = arith.constant 0 : i32
    %c0_i32_0 = arith.constant 0 : i32
    return %arg0, %c0_i32, %arg2 : i32, i32, i32
  }
  func.func @transform_2(%arg0: i32, %arg1: i32, %arg2: i32) -> (i32, i32, i32) {
    %c0_i32 = arith.constant 0 : i32
    %c0_i32_0 = arith.constant 0 : i32
    return %arg0, %c0_i32, %arg1 : i32, i32, i32
  }
  func.func @transform_3(%arg0: i32, %arg1: i32, %arg2: i32) -> (i32, i32) {
    %c0_i32 = arith.constant 0 : i32
    %c0_i32_0 = arith.constant 0 : i32
    %c0_i32_1 = arith.constant 0 : i32
    return %c0_i32, %c0_i32_0 : i32, i32
  }
  func.func @transform_4(%arg0: i32, %arg1: i32, %arg2: i32) -> (i32, i32) {
    %c0_i32 = arith.constant 0 : i32
    %c0_i32_0 = arith.constant 0 : i32
    %c0_i32_1 = arith.constant 0 : i32
    return %c0_i32, %c0_i32_0 : i32, i32
  }
  func.func @transform_5(%arg0: i32, %arg1: i32, %arg2: i32) -> (i32, i32, i32) {
    %c0_i32 = arith.constant 0 : i32
    %c0_i32_0 = arith.constant 0 : i32
    return %arg0, %c0_i32, %arg1 : i32, i32, i32
  }
}

</mosaic_0001>

<bundles_post_ra>
// kernel: tpu_custom_call.1
= control target key start
LH: loop header
LB: loop body
LE: loop exit
PB: predicated region body
PF: predicated region fallthrough
CT: control target
= control target key end

     0   :  { %10 = vsyncpa [#allocation7], 0  ;;  %s2816_s0 = inlined_call_operand.hbm [shape: bf16[2,4,256], index: 0, kind: input, shape index: {}]   ;;  %s2817_s1 = inlined_call_operand.vmem [shape: bf16[2,8,256], index: 1, kind: input, shape index: {}]   ;;  %s2818_s2 = inlined_call_operand.vmem [shape: f32[2,4,256], index: 2, kind: input, shape index: {}]   ;;  %s2819_s3 = inlined_call_operand.vmem [shape: bf16[32,4], index: 3, kind: input, shape index: {}]   ;;  %s2820_s4 = inlined_call_operand.vmem [shape: bf16[36,8], index: 4, kind: input, shape index: {}]   ;;  %s2821_s5 = inlined_call_operand.hbm [shape: f32[2,4,256], index: 5, kind: output, shape index: {}]  }
   0x1   :  { %12 = vsyncpa [#allocation7 + $0x1], 0 }
   0x2   :  { %13 = vsyncpa [#allocation8], 0 }
   0x3   :  { %15 = vsyncpa [#allocation8 + $0x1], 0  ;;  %s1957_s18 = smov 0   ;;  %s1959_s19 = smov 0  }
   0x4   :  { %s1961_s20 = smov 0   ;;  %s1963_s21 = smov 0  }
   0x5   :  { %s1965_s22 = smov 0   ;;  %s1967_s23 = smov 0  }
   0x6 LB: > { %s1536_s24 = sadd.s32 4294967295, %s1919_s23   ;;  %s1537_s25 = sadd.s32 4294967294, %s1919_s23   ;;  %s1919_s23 = sphi %s1967_s23, %s21_s23   ;;  %s1915_s22 = sphi %s1965_s22, %s2981_s22   ;;  %s1911_s21 = sphi %s1963_s21, %s2980_s21   ;;  %s1907_s20 = sphi %s1961_s20, %s2979_s20   ;;  %s1903_s19 = sphi %s1959_s19, %s2978_s19   ;;  %s1899_s18 = sphi %s1957_s18, %s2977_s18  }
   0x7   : > { %s40_s26 = sadd.s32 1, %s1915_s22  ;;  %s49_s27 = sadd.s32 1, %s1907_s20 }
   0x8   : > { %p42_p0 = scmp.ge.s32.totalorder %s40_s26, 2  ;;  %p56_p1 = scmp.ne.s32.totalorder %s1907_s20, %s1903_s19 }
   0x9   : > { %p57_p2 = scmp.eq.s32.totalorder %s1919_s23, 0  ;;  %p62_p3 = scmp.ne.s32.totalorder %s1903_s19, %s1899_s18 }
   0xa   : > { %s2983_s26 = smov (%p42_p0, %s40_s26), 0  ;;  %p63_p5 = scmp.eq.s32.totalorder %s1536_s24, 0 }
   0xb   : > { %p1998_p4 = por %p57_p2, %p56_p1  ;;  %s44_s29 = ssub.s32 %s1915_s22, %s2983_s26 }
   0xc   : > { %p186_p6 = scmp.eq.s32.totalorder %s1536_s24, 1  ;;  %p47_p7 = scmp.eq.s32.totalorder %s44_s29, 0 }
   0xd   : > { %p2004_p8 = por %p63_p5, %p62_p3  ;;  %p192_p10 = scmp.eq.s32.totalorder %s1537_s25, 1 }
   0xe   : > { %p2008_p9 = por %p186_p6, %p56_p1  ;;  %p1618_p13 = scmp.lt.s32.totalorder %s1919_s23, 2 }
   0xf   : > { %s2013_s7 = scalar_select %p47_p7, %s1907_s20, %s49_s27  }
  0x10   : > { %p2015_p11 = por %p192_p10, %p62_p3  ;;  %s218_s9 = sand.u32 1, %s1907_s20  }
  0x11   : > { %s1540_s10 = sshll.u32 %s218_s9, 2  ;;  %s1594_s11 = sshll.u32 %s1915_s22, 6 }
  0x12   : > { %s2876_s8 = scalar_select %p2015_p11, 1, 0 }
  0x13   : > { %s230_s14 = scalar_lea.hbm %s2816_s0, %s1594_s11  ;;  %s222_s15 = scalar_lea.vmem [#allocation6], %s1540_s10 }
  0x14   : > { %s232_s16 = sshll.u32 %s222_s15, 4  ;;  %p2028_p0 = pnand %p1618_p13, %p1998_p4  ;;  %s233_s16 = int_to_ptr.vmem [resolvable:$true] %s232_s16 }
  0x15   : > { %p1543_p1 = scmp.ge.s32.totalorder %s1919_s23, 1  ;;  %p263_p2 = scmp.lt.s32.totalorder %s1919_s23, 3 }
  0x16   : > { %s219_s24 = scalar_lea.sflag [#allocation7], %s218_s9  ;;  %p1813_p3 = pneg %p2028_p0 }
  0x17   : > { %s1824_s25 = scalar_lea.vmem %s233_s16, 64  ;;  %s1921_s27 = smov [#allocation6]  }
  0x18   : > { %p1825_p5 = scmp.ne.s32.totalorder %s233_s16, %s1824_s25  ;;  %s1829_s29 = sshll.u32 %s1921_s27, 4  ;;  %s1830_s29 = int_to_ptr.vmem [resolvable:$false] %s1829_s29 }
  0x19   : > { %s1831_s10 = scalar_lea.vmem %s1830_s29, 128  ;;  %p1832_p10 = scmp.lt.s32.totalorder %s233_s16, %s1830_s29 }
  0x1a   : > { %p1827_p6 = pnand %p1825_p5, %p1813_p3  ;;  %p1833_p12 = scmp.lt.s32.totalorder %s1831_s10, %s1824_s25 }
  0x1c   : > { %p1828_p7 = pneg %p1827_p6  ;;  %p1834_p4 = por %p1833_p12, %p1832_p10 }
  0x1e   : > { %p1835_p13 = pnand %p1834_p4, %p1828_p7 }
  0x20   : > { %1838 = shalt.err (!%p1835_p13)
}
  0x21   : > { %1613 = dma.hbm_to_vmem [thread:$0]  (!%p2028_p0), %s230_s14, 64, %s233_s16, %s219_s24  }
  0x22   : > { %p264_p11 = pnand %p1543_p1, %p263_p2 }
  0x24   : > { %267 = sbr.rel (%p264_p11) target bundleno = 1049 (0x419), region = 40 }
  0x29   : > { %s2043_s28 = sand.u32 1, %s1903_s19  }
  0x2a   : > { %s1544_s9 = sshll.u32 %s2043_s28, 2  ;;  %s270_s11 = scalar_lea.sflag [#allocation7], %s2043_s28 }
  0x2b   : > { %s273_s12 = scalar_lea.vmem [#allocation6], %s1544_s9 }
  0x2c   : > { %1890 = dma.done.wait (%p2004_p8), %s270_s11, 64  }
  0x2d   : > { %1892 = vsyncadd (%p2004_p8), %s270_s11, 4294967232  ;;  %p320_p12 = scmp.lt.s32.totalorder %s1911_s21, 1  ;;  %v1922_v0 = vmov 0   ;;  %vm383_vm0 = vcmask 1041408   ;;  %vm505_vm1 = vcmask 1043456   ;;  %v1672_v7 = vld [vmem:[%s2819_s3] sm:$0xff]   ;;  %v2822_v59 = vlaneseq }
  0x2e   : > { %422 = vmatprep.mubr.bf16.mxu1 %v1922_v0  ;;  %716 = vmatprep.mubr.bf16.mxu0 %v1922_v0  ;;  %v1552_v1 = vld.sshfl [vmem:[%s273_s12] sm:$0x33 pattern:$0x76325410]  ;;  %vm376_vm2 = vcmask 31744   ;;  %vm495_vm3 = vcmask 64512  }
  0x2f   : > { %s2055_s13 = scalar_select %p320_p12, %s1911_s21, 1  ;;  %v375_v2 = vcombine.high %v1552_v1, %v1552_v1  ;;  %v385_v3 = vsel %vm383_vm0, %v1552_v1, 0  ;;  %v1675_v9 = vld [vmem:[%s2819_s3 + $0x8] sm:$0xff]   ;;  %v1676_v10 = vld [vmem:[%s2820_s4] sm:$0xff]   ;;  %vm635_vm4 = vcmask 261120   ;;  %vm2131_vm5 = vcmp.lt.s32.totalorder %v2822_v59, 256 }
  0x30   : > { %v1677_v11 = vld [vmem:[%s2820_s4 + $0x8] sm:$0xff]   ;;  %v1678_v49 = vld [vmem:[%s2820_s4 + $0x10] ss:$0 sps:$4 sm:$0x33]   ;;  %v2878_v61 = vmov 0  ;;  %v1923_v62 = vmov -inf  }
  0x31   : > { %s1595_s14 = sshll.u32 %s2055_s13, 3  ;;  %1553 = vmatprep.subr.msk.bf16.mxu1 %vm383_vm0, %v375_v2  ;;  %v2879_v61 = vsel %vm2131_vm5, 4294967295, %v2878_v61  ;;  %349 = vst.msk [vmem:[#allocation3] sm:$0x3] %vm2131_vm5, %v1923_v62  ;;  %s1545_s16 = sshll.u32 %s2043_s28, 3 }
  0x32   : > { %s327_s30 = scalar_lea.vmem %s2817_s1, %s1595_s14  ;;  %405 = vmatpush1.bf16.msra.mxu1 %v385_v3  ;;  %2880 = vst [vmem:[#allocation12_spill] sm:$0xff] %v2879_v61  ;;  %s337_s24 = scalar_lea.vmem %s2818_s2, %s1595_s14 }
  0x33   : > { %v476_v4 = vld [vmem:[%s327_s30] sm:$0xff]  ;;  %s1601_s25 = sshll.u32 %s1911_s21, 7  ;;  %s317_s27 = scalar_lea.vmem [#allocation9], %s1545_s16 }
  0x34   : > { %v1564_v5 = vcombine.high %v476_v4, %v476_v4  ;;  %v1563_v6 = vcombine.low %v476_v4, %v476_v4  ;;  %s1413_s29 = sshll.u32 %s317_s27, 4  ;;  %s1411_s9 = scalar_lea.hbm %s2821_s5, %s1601_s25  ;;  %s1414_s29 = int_to_ptr.vmem [resolvable:$true] %s1413_s29 }
  0x35   : > { %1554 = vmatmul.mubr.msk.bf16.vlgmr.msra.gmra.mxu1 %vm376_vm2, %v1672_v7  ;;  %s1397_s14 = scalar_lea.sflag [#allocation8], %s2043_s28  ;;  %s1839_s11 = scalar_lea.vmem %s1414_s29, 128 }
  0x36   : > { %1565 = vmatprep.subr.msk.bf16.mxu1 %vm505_vm1, %v1564_v5  ;;  %v507_v8 = vsel %vm505_vm1, %v1563_v6, 0  ;;  %432 = vmatprep.mubr.bf16.mxu1 %v1922_v0  ;;  %p1840_p8 = scmp.ne.s32.totalorder %s1414_s29, %s1839_s11  ;;  %s1926_s12 = smov [#allocation9]  }
  0x37   : > { %527 = vmatpush1.bf16.msra.mxu1 %v507_v8  ;;  %s1843_s15 = sshll.u32 %s1926_s12, 4  ;;  %s1844_s15 = int_to_ptr.vmem [resolvable:$false] %s1843_s15 }
  0x38   : > { %p1841_p11 = pnand %p1840_p8, %p2008_p9  ;;  %s1845_s21 = scalar_lea.vmem %s1844_s15, 256 }
  0x39   : > { %p1846_p1 = scmp.lt.s32.totalorder %s1414_s29, %s1844_s15  ;;  %p1847_p2 = scmp.lt.s32.totalorder %s1845_s21, %s1839_s11 }
  0x3a   : > { %p1842_p0 = pneg %p1841_p11 }
  0x3b   : > { %p1848_p3 = por %p1847_p2, %p1846_p1 }
  0x3d   : > { %1555 = vmatmul.mubr.msk.bf16.gmra.mxu1 %vm376_vm2, %v1675_v9  ;;  %p1849_p5 = pnand %p1848_p3, %p1842_p0 }
  0x3e   : > { %544 = vmatprep.mubr.bf16.mxu1 %v1922_v0 }
  0x45   : > { %1566 = vmatmul.mubr.msk.bf16.vlgmr.msra.gmra.mxu1 %vm495_vm3, %v1676_v10 }
  0x46   : > { %554 = vmatprep.mubr.bf16.mxu1 %v1922_v0 }
  0x4d   : > { %1567 = vmatmul.mubr.msk.bf16.gmra.mxu1 %vm495_vm3, %v1677_v11 }
  0x4e   : > { %564 = vmatprep.mubr.bf16.mxu1 %v1922_v0 }
  0x55   : > { %1568 = vmatmul.mubr.msk.bf16.gmra.mxu1 %vm495_vm3, %v1678_v49 }
  0xf5   : > { %v424_v12 = vpop.f32.mrf.mxu1 }
  0xf7   : > { %v426_v13 = vpop.f32.mrf.mxu1 }
  0xf9   : > { %v428_v14 = vpop.f32.mrf.mxu1 }
  0xfa   : > { %v1602_v25 = vpack.c.bf16 %v428_v14, %v424_v12 }
  0xfb   : > { %v430_v15 = vpop.f32.mrf.mxu1 }
  0xfc   : > { %v1603_v23 = vpack.c.bf16 %v430_v15, %v426_v13 }
  0xfd   : > { %v434_v16 = vpop.f32.mrf.mxu1 }
  0xff   : > { %v436_v17 = vpop.f32.mrf.mxu1 }
 0x101   : > { %v438_v18 = vpop.f32.mrf.mxu1 }
 0x102   : > { %v1604_v21 = vpack.c.bf16 %v438_v18, %v434_v16 }
 0x103   : > { %v440_v19 = vpop.f32.mrf.mxu1 }
 0x104   : > { %v1605_v20 = vpack.c.bf16 %v440_v19, %v436_v17 }
 0x105   : > { %v546_v22 = vpop.f32.mrf.mxu1 }
 0x106   : > { %696 = vmatprep.subr.bf16.mxu0 %v1605_v20 }
 0x107   : > { %v548_v24 = vpop.f32.mrf.mxu1  ;;  %697 = vmatpush1.bf16.msra.mxu0 %v1604_v21 }
 0x108   : > { %698 = vmatprep.subr.bf16.mxu0 %v1603_v23 }
 0x109   : > { %v550_v26 = vpop.f32.mrf.mxu1 }
 0x10a   : > { %v573_v27 = vpack.c.bf16 %v550_v26, %v546_v22 }
 0x10b   : > { %v552_v28 = vpop.f32.mrf.mxu1  ;;  %699 = vmatpush1.bf16.msra.mxu0 %v1602_v25 }
 0x10c   : > { %583 = vxpose.xlu0.c.b16.start [1/2] (short) %v573_v27, 128  ;;  %v574_v29 = vpack.c.bf16 %v552_v28, %v548_v24 }
 0x10d   : > { %v556_v30 = vpop.f32.mrf.mxu1 }
 0x10e   : > { %599 = vxpose.xlu1.c.b16.start [1/2] (short) %v574_v29, 128 }
 0x10f   : > { %v558_v31 = vpop.f32.mrf.mxu1 }
 0x111   : > { %v560_v32 = vpop.f32.mrf.mxu1 }
 0x112   : > { %v575_v33 = vpack.c.bf16 %v560_v32, %v556_v30 }
 0x113   : > { %v562_v34 = vpop.f32.mrf.mxu1 }
 0x114   : > { %v576_v35 = vpack.c.bf16 %v562_v34, %v558_v31  ;;  %584 = vxpose.xlu0.c.b16.end [2/2] (short) %v575_v33, 128 }
 0x116   : > { %600 = vxpose.xlu1.c.b16.end [2/2] (short) %v576_v35, 128 }
 0x172   : > { %v591_v36 = vpop.trf.xlu0 }
 0x173   : > { %1573 = vmatmul.mubr.msk.bf16.vlgmr.msra.gmra.mxu0 %vm635_vm4, %v591_v36 }
 0x174   : > { %726 = vmatprep.mubr.bf16.mxu0 %v1922_v0  ;;  %v607_v44 = vpop.trf.xlu1 }
 0x176   : > { %v592_v37 = vpop.trf.xlu0 }
 0x178   : > { %v608_v45 = vpop.trf.xlu1 }
 0x17a   : > { %v593_v38 = vpop.trf.xlu0 }
 0x17b   : > { %1574 = vmatmul.mubr.msk.bf16.gmra.mxu0 %vm635_vm4, %v592_v37 }
 0x17c   : > { %736 = vmatprep.mubr.bf16.mxu0 %v1922_v0  ;;  %v609_v46 = vpop.trf.xlu1 }
 0x17e   : > { %v594_v39 = vpop.trf.xlu0 }
 0x180   : > { %v610_v47 = vpop.trf.xlu1 }
 0x182   : > { %v595_v40 = vpop.trf.xlu0 }
 0x183   : > { %1575 = vmatmul.mubr.msk.bf16.gmra.mxu0 %vm635_vm4, %v593_v38 }
 0x184   : > { %746 = vmatprep.mubr.bf16.mxu0 %v1922_v0  ;;  %v611_v48 = vpop.trf.xlu1 }
 0x186   : > { %v596_v41 = vpop.trf.xlu0 }
 0x188   : > { %v612_v50 = vpop.trf.xlu1 }
 0x18a   : > { %v597_v42 = vpop.trf.xlu0 }
 0x18b   : > { %1576 = vmatmul.mubr.msk.bf16.gmra.mxu0 %vm635_vm4, %v594_v39 }
 0x18c   : > { %756 = vmatprep.mubr.bf16.mxu0 %v1922_v0  ;;  %v613_v51 = vpop.trf.xlu1 }
 0x18e   : > { %v598_v43 = vpop.trf.xlu0 }
 0x190   : > { %v614_v52 = vpop.trf.xlu1 }
 0x193   : > { %1577 = vmatmul.mubr.msk.bf16.gmra.mxu0 %vm635_vm4, %v595_v40 }
 0x194   : > { %766 = vmatprep.mubr.bf16.mxu0 %v1922_v0 }
 0x19b   : > { %1578 = vmatmul.mubr.msk.bf16.gmra.mxu0 %vm635_vm4, %v596_v41 }
 0x19c   : > { %776 = vmatprep.mubr.bf16.mxu0 %v1922_v0 }
 0x1a3   : > { %1579 = vmatmul.mubr.msk.bf16.gmra.mxu0 %vm635_vm4, %v597_v42 }
 0x1a4   : > { %786 = vmatprep.mubr.bf16.mxu0 %v1922_v0 }
 0x1ab   : > { %1580 = vmatmul.mubr.msk.bf16.gmra.mxu0 %vm635_vm4, %v598_v43 }
 0x1ac   : > { %796 = vmatprep.mubr.bf16.mxu0 %v1922_v0 }
 0x1b3   : > { %1581 = vmatmul.mubr.msk.bf16.gmra.mxu0 %vm635_vm4, %v607_v44 }
 0x1b4   : > { %806 = vmatprep.mubr.bf16.mxu0 %v1922_v0 }
 0x1bb   : > { %1582 = vmatmul.mubr.msk.bf16.gmra.mxu0 %vm635_vm4, %v608_v45 }
 0x1bc   : > { %816 = vmatprep.mubr.bf16.mxu0 %v1922_v0 }
 0x1c3   : > { %1583 = vmatmul.mubr.msk.bf16.gmra.mxu0 %vm635_vm4, %v609_v46 }
 0x1c4   : > { %826 = vmatprep.mubr.bf16.mxu0 %v1922_v0 }
 0x1cb   : > { %1584 = vmatmul.mubr.msk.bf16.gmra.mxu0 %vm635_vm4, %v610_v47 }
 0x1cc   : > { %836 = vmatprep.mubr.bf16.mxu0 %v1922_v0 }
 0x1d3   : > { %1585 = vmatmul.mubr.msk.bf16.gmra.mxu0 %vm635_vm4, %v611_v48 }
 0x1d4   : > { %846 = vmatprep.mubr.bf16.mxu0 %v1922_v0 }
 0x1db   : > { %1586 = vmatmul.mubr.msk.bf16.gmra.mxu0 %vm635_vm4, %v612_v50 }
 0x1dc   : > { %856 = vmatprep.mubr.bf16.mxu0 %v1922_v0 }
 0x1e3   : > { %1587 = vmatmul.mubr.msk.bf16.gmra.mxu0 %vm635_vm4, %v613_v51 }
 0x1e4   : > { %866 = vmatprep.mubr.bf16.mxu0 %v1922_v0 }
 0x1eb   : > { %1588 = vmatmul.mubr.msk.bf16.gmra.mxu0 %vm635_vm4, %v614_v52 }
 0x233   : > { %v2116_v53 = vpop.f32.mrf.mxu0 }
 0x235   : > { %v2118_v54 = vpop.f32.mrf.mxu0 }
 0x237   : > { %v2120_v55 = vpop.f32.mrf.mxu0 }
 0x239   : > { %v2122_v56 = vpop.f32.mrf.mxu0 }
 0x23b   : > { %v2124_v57 = vpop.f32.mrf.mxu0 }
 0x23c   : > { %v878_v41 = vmax.f32 %v2116_v53, %v2124_v57 }
 0x23d   : > { %v2126_v58 = vpop.f32.mrf.mxu0 }
 0x23e   : > { %v915_v43 = vmax.f32 %v2118_v54, %v2126_v58 }
 0x23f   : > { %v2128_v60 = vpop.f32.mrf.mxu0 }
 0x240   : > { %v879_v42 = vmax.f32 %v2120_v55, %v2128_v60 }
 0x241   : > { %v2137_v63 = vpop.f32.mrf.mxu0 }
 0x242   : > { %2881 = vst [vmem:[#allocation13_spill] sm:$0xff] %v2137_v63  ;;  %v916_v45 = vmax.f32 %v2122_v56, %v2137_v63 }
 0x243   : > { %v2139_v0 = vpop.f32.mrf.mxu0 }
 0x244   : > { %v880_v46 = vmax.f32 %v878_v41, %v2139_v0 }
 0x245   : > { %v2141_v1 = vpop.f32.mrf.mxu0 }
 0x246   : > { %v917_v48 = vmax.f32 %v915_v43, %v2141_v1 }
 0x247   : > { %v2143_v2 = vpop.f32.mrf.mxu0 }
 0x248   : > { %2882 = vst [vmem:[#allocation14_spill] sm:$0xff] %v2143_v2  ;;  %v881_v47 = vmax.f32 %v879_v42, %v2143_v2 }
 0x249   : > { %v2145_v3 = vpop.f32.mrf.mxu0 }
 0x24a   : > { %v918_v50 = vmax.f32 %v916_v45, %v2145_v3 }
 0x24b   : > { %v2147_v4 = vpop.f32.mrf.mxu0 }
 0x24c   : > { %v882_v51 = vmax.f32 %v880_v46, %v2147_v4 }
 0x24d   : > { %v2149_v5 = vpop.f32.mrf.mxu0 }
 0x24e   : > { %v919_v62 = vmax.f32 %v917_v48, %v2149_v5 }
 0x24f   : > { %v2151_v6 = vpop.f32.mrf.mxu0 }
 0x250   : > { %2883 = vst [vmem:[#allocation15_spill] sm:$0xff] %v2151_v6  ;;  %v883_v52 = vmax.f32 %v881_v47, %v2151_v6 }
 0x251   : > { %v2153_v7 = vpop.f32.mrf.mxu0 }
 0x252   : > { %v920_v63 = vmax.f32 %v918_v50, %v2153_v7 }
 0x253   : > { %v2155_v8 = vpop.f32.mrf.mxu0 }
 0x254   : > { %v884_v41 = vmax.f32 %v882_v51, %v2155_v8 }
 0x255   : > { %v2157_v9 = vpop.f32.mrf.mxu0 }
 0x256   : > { %v921_v43 = vmax.f32 %v919_v62, %v2157_v9 }
 0x257   : > { %v2159_v10 = vpop.f32.mrf.mxu0 }
 0x258   : > { %2884 = vst [vmem:[#allocation16_spill] sm:$0xff] %v2159_v10  ;;  %v885_v42 = vmax.f32 %v883_v52, %v2159_v10 }
 0x259   : > { %v2161_v11 = vpop.f32.mrf.mxu0 }
 0x25a   : > { %v922_v45 = vmax.f32 %v920_v63, %v2161_v11 }
 0x25b   : > { %v2163_v12 = vpop.f32.mrf.mxu0 }
 0x25c   : > { %v886_v46 = vmax.f32 %v884_v41, %v2163_v12 }
 0x25d   : > { %v2165_v13 = vpop.f32.mrf.mxu0 }
 0x25e   : > { %v923_v48 = vmax.f32 %v921_v43, %v2165_v13  ;;  %v2831_v43 = vmov 0.0  }
 0x25f   : > { %v2167_v14 = vpop.f32.mrf.mxu0  ;;  %350 = vst.msk [vmem:[#allocation4] sm:$0x3] %vm2131_vm5, %v2831_v43 }
 0x260   : > { %2885 = vst [vmem:[#allocation17_spill] sm:$0xff] %v2167_v14  ;;  %v887_v47 = vmax.f32 %v885_v42, %v2167_v14 }
 0x261   : > { %v2169_v15 = vpop.f32.mrf.mxu0 }
 0x262   : > { %v924_v50 = vmax.f32 %v922_v45, %v2169_v15 }
 0x263   : > { %v2171_v16 = vpop.f32.mrf.mxu0 }
 0x264   : > { %v888_v51 = vmax.f32 %v886_v46, %v2171_v16 }
 0x265   : > { %v2173_v17 = vpop.f32.mrf.mxu0 }
 0x266   : > { %v925_v62 = vmax.f32 %v923_v48, %v2173_v17 }
 0x267   : > { %v2175_v18 = vpop.f32.mrf.mxu0 }
 0x268   : > { %v889_v52 = vmax.f32 %v887_v47, %v2175_v18 }
 0x269   : > { %v2177_v19 = vpop.f32.mrf.mxu0 }
 0x26a   : > { %2886 = vst [vmem:[#allocation18_spill] sm:$0xff] %v2177_v19  ;;  %v926_v63 = vmax.f32 %v924_v50, %v2177_v19 }
 0x26b   : > { %v2179_v20 = vpop.f32.mrf.mxu0 }
 0x26c   : > { %2887 = vst [vmem:[#allocation19_spill] sm:$0xff] %v2179_v20  ;;  %v890_v41 = vmax.f32 %v888_v51, %v2179_v20 }
 0x26d   : > { %v2181_v21 = vpop.f32.mrf.mxu0 }
 0x26e   : > { %v927_v45 = vmax.f32 %v925_v62, %v2181_v21 }
 0x26f   : > { %v2183_v22 = vpop.f32.mrf.mxu0 }
 0x270   : > { %2888 = vst [vmem:[#allocation20_spill] sm:$0xff] %v2183_v22  ;;  %v891_v42 = vmax.f32 %v889_v52, %v2183_v22 }
 0x271   : > { %v2185_v23 = vpop.f32.mrf.mxu0 }
 0x272   : > { %v928_v46 = vmax.f32 %v926_v63, %v2185_v23 }
 0x273   : > { %v2187_v24 = vpop.f32.mrf.mxu0 }
 0x274   : > { %v892_v47 = vmax.f32 %v890_v41, %v2187_v24 }
 0x275   : > { %v2189_v25 = vpop.f32.mrf.mxu0 }
 0x276   : > { %v929_v51 = vmax.f32 %v927_v45, %v2189_v25 }
 0x277   : > { %v2191_v26 = vpop.f32.mrf.mxu0 }
 0x278   : > { %v893_v48 = vmax.f32 %v891_v42, %v2191_v26 }
 0x279   : > { %v2193_v27 = vpop.f32.mrf.mxu0 }
 0x27a   : > { %v930_v52 = vmax.f32 %v928_v46, %v2193_v27 }
 0x27b   : > { %v2195_v28 = vpop.f32.mrf.mxu0 }
 0x27c   : > { %v894_v22 = vmax.f32 %v892_v47, %v2195_v28 }
 0x27d   : > { %v2197_v29 = vpop.f32.mrf.mxu0 }
 0x27e   : > { %v931_v62 = vmax.f32 %v929_v51, %v2197_v29 }
 0x27f   : > { %v2199_v30 = vpop.f32.mrf.mxu0 }
 0x280   : > { %2889 = vst [vmem:[#allocation21_spill] sm:$0xff] %v2199_v30  ;;  %v895_v20 = vmax.f32 %v893_v48, %v2199_v30 }
 0x281   : > { %v2201_v31 = vpop.f32.mrf.mxu0 }
 0x282   : > { %v932_v63 = vmax.f32 %v930_v52, %v2201_v31 }
 0x283   : > { %v2203_v32 = vpop.f32.mrf.mxu0 }
 0x284   : > { %v896_v41 = vmax.f32 %v894_v22, %v2203_v32 }
 0x285   : > { %v2205_v33 = vpop.f32.mrf.mxu0 }
 0x286   : > { %v933_v45 = vmax.f32 %v931_v62, %v2205_v33 }
 0x287   : > { %v2207_v34 = vpop.f32.mrf.mxu0 }
 0x288   : > { %2890 = vst [vmem:[#allocation22_spill] sm:$0xff] %v2207_v34  ;;  %v897_v42 = vmax.f32 %v895_v20, %v2207_v34 }
 0x289   : > { %v2209_v35 = vpop.f32.mrf.mxu0 }
 0x28a   : > { %v934_v46 = vmax.f32 %v932_v63, %v2209_v35 }
 0x28b   : > { %v2211_v36 = vpop.f32.mrf.mxu0 }
 0x28c   : > { %v898_v47 = vmax.f32 %v896_v41, %v2211_v36 }
 0x28d   : > { %v2213_v37 = vpop.f32.mrf.mxu0 }
 0x28e   : > { %v935_v51 = vmax.f32 %v933_v45, %v2213_v37 }
 0x28f   : > { %v2215_v38 = vpop.f32.mrf.mxu0 }
 0x290   : > { %2891 = vst [vmem:[#allocation23_spill] sm:$0xff] %v2215_v38  ;;  %v899_v48 = vmax.f32 %v897_v42, %v2215_v38 }
 0x291   : > { %v2217_v39 = vpop.f32.mrf.mxu0 }
 0x292   : > { %v936_v52 = vmax.f32 %v934_v46, %v2217_v39 }
 0x293   : > { %v2219_v40 = vpop.f32.mrf.mxu0 }
 0x294   : > { %v900_v22 = vmax.f32 %v898_v47, %v2219_v40 }
 0x295   : > { %v2227_v44 = vpop.f32.mrf.mxu0 }
 0x296   : > { %2892 = vst [vmem:[#allocation24_spill] sm:$0xff] %v2227_v44  ;;  %v937_v62 = vmax.f32 %v935_v51, %v2227_v44 }
 0x297   : > { %v2234_v49 = vpop.f32.mrf.mxu0 }
 0x298   : > { %2893 = vst [vmem:[#allocation25_spill] sm:$0xff] %v2234_v49  ;;  %v901_v20 = vmax.f32 %v899_v48, %v2234_v49 }
 0x299   : > { %v2240_v59 = vpop.f32.mrf.mxu0 }
 0x29a   : > { %2894 = vst [vmem:[#allocation26_spill] sm:$0xff] %v2240_v59  ;;  %v938_v63 = vmax.f32 %v936_v52, %v2240_v59 }
 0x29b   : > { %v2246_v2 = vpop.f32.mrf.mxu0 }
 0x29c   : > { %2895 = vst [vmem:[#allocation27_spill] sm:$0xff] %v2246_v2  ;;  %v902_v41 = vmax.f32 %v900_v22, %v2246_v2 }
 0x29d   : > { %v2252_v6 = vpop.f32.mrf.mxu0 }
 0x29e   : > { %2896 = vst [vmem:[#allocation28_spill] sm:$0xff] %v2252_v6  ;;  %v939_v45 = vmax.f32 %v937_v62, %v2252_v6 }
 0x29f   : > { %v2258_v10 = vpop.f32.mrf.mxu0 }
 0x2a0   : > { %2897 = vst [vmem:[#allocation29_spill] sm:$0xff] %v2258_v10  ;;  %v903_v42 = vmax.f32 %v901_v20, %v2258_v10 }
 0x2a1   : > { %v2263_v14 = vpop.f32.mrf.mxu0 }
 0x2a2   : > { %2898 = vst [vmem:[#allocation30_spill] sm:$0xff] %v2263_v14  ;;  %v940_v46 = vmax.f32 %v938_v63, %v2263_v14 }
 0x2a3   : > { %v2272_v50 = vpop.f32.mrf.mxu0 }
 0x2a4   : > { %2899 = vst [vmem:[#allocation31_spill] sm:$0xff] %v2272_v50  ;;  %v904_v47 = vmax.f32 %v902_v41, %v2272_v50 }
 0x2a5   : > { %v2278_v19 = vpop.f32.mrf.mxu0 }
 0x2a6   : > { %2900 = vst [vmem:[#allocation32_spill] sm:$0xff] %v2278_v19  ;;  %v941_v51 = vmax.f32 %v939_v45, %v2278_v19  ;;  %v1925_v45 = vmov 1966171168  }
 0x2a7   : > { %v2284_v43 = vpop.f32.mrf.mxu0  ;;  %v956_v19 = vunpack.c.l.s4 %v1925_v45 }
 0x2a8   : > { %2901 = vst [vmem:[#allocation33_spill] sm:$0xff] %v2284_v43  ;;  %v905_v48 = vmax.f32 %v903_v42, %v2284_v43 }
 0x2a9   : > { %v2290_v30 = vpop.f32.mrf.mxu0 }
 0x2aa   : > { %2902 = vst [vmem:[#allocation34_spill] sm:$0xff] %v2290_v30  ;;  %v942_v52 = vmax.f32 %v940_v46, %v2290_v30 }
 0x2ab   : > { %v2296_v34 = vpop.f32.mrf.mxu0 }
 0x2ac   : > { %2903 = vst [vmem:[#allocation35_spill] sm:$0xff] %v2296_v34  ;;  %v906_v22 = vmax.f32 %v904_v47, %v2296_v34 }
 0x2ad   : > { %v2302_v38 = vpop.f32.mrf.mxu0 }
 0x2ae   : > { %v943_v62 = vmax.f32 %v941_v51, %v2302_v38  ;;  %v2319_v51 = vpop.f32.mrf.mxu1 }
 0x2af   : > { %v2308_v49 = vpop.f32.mrf.mxu0  ;;  %2906 = vst [vmem:[#allocation37_spill] sm:$0xff] %v2319_v51 }
 0x2b0   : > { %2904 = vst [vmem:[#allocation36_spill] sm:$0xff] %v2308_v49  ;;  %v907_v20 = vmax.f32 %v905_v48, %v2308_v49  ;;  %v957_v48 = vunpack.c.0.s8 %v956_v19  ;;  %v2905_v49 = vlaneseq }
 0x2b1   : > { %v2314_v10 = vpop.f32.mrf.mxu0 }
 0x2b2   : > { %v908_v6 = vmax.f32 %v906_v22, %v907_v20  ;;  %v944_v63 = vmax.f32 %v942_v52, %v2314_v10  ;;  %v959_v59 = vshrl.u32 %v2905_v49, 7 }
 0x2b4   : > { %v909_v41 = vrot.slane %v908_v6, 4  ;;  %v945_v50 = vmax.f32 %v943_v62, %v944_v63  ;;  %v2321_v20 = vsub.s32 %v957_v48, %v959_v59  ;;  %v568_v62 = vpop.f32.mrf.mxu1  ;;  %v877_v63 = vld [vmem:[#allocation3] sm:$0x3]  ;;  %v2327_v49 = vsub.s32 0, %v959_v59 }
 0x2b6   : > { %v910_v42 = vmax.f32 %v908_v6, %v909_v41  ;;  %v946_v43 = vrot.slane %v945_v50, 4  ;;  %2907 = vst [vmem:[#allocation38_spill] sm:$0xff] %v2321_v20  ;;  %2908 = vst [vmem:[#allocation39_spill] sm:$0xff] %v2327_v49 }
 0x2b8   : > { %v911_v14 = vrot.slane %v910_v42, 2  ;;  %v947_v2 = vmax.f32 %v945_v50, %v946_v43  ;;  %v578_v50 = vpack.c.bf16 %v568_v62, %v568_v62 }
 0x2ba   : > { %v912_v46 = vmax.f32 %v910_v42, %v911_v14  ;;  %v948_v30 = vrot.slane %v947_v2, 2  ;;  %v570_v14 = vpop.f32.mrf.mxu1  ;;  %1358 = vmatprep.mubr.bf16.mxu1 %v578_v50 }
 0x2bc   : > { %v913_v47 = vrot.slane %v912_v46, 1  ;;  %v949_v34 = vmax.f32 %v947_v2, %v948_v30  ;;  %v571_v2 = vpop.f32.mrf.mxu1 }
 0x2be   : > { %v950_v44 = vrot.slane %v949_v34, 1  ;;  %v914_v22 = vmax.f32 %v912_v46, %v913_v47 }
 0x2c0   : > { %v951_v52 = vmax.f32 %v949_v34, %v950_v44  ;;  %v2329_v34 = vsub.s32 1, %v959_v59 }
 0x2c2   : > { %v954_v6 = vcombine.low %v914_v22, %v951_v52  ;;  %2909 = vst [vmem:[#allocation40_spill] sm:$0xff] %v2329_v34 }
 0x2c4   : > { %v961_v43 = vrot.slane %v954_v6, %v2321_v20 }
 0x2c6   : > { %v968_v41 = vrot.slane %v961_v43, %v2321_v20 }
 0x2c8   : > { %v970_v19 = vmax.f32 %v877_v63, %v968_v41 }
 0x2ca   : > { %v971_v30 = vsub.f32 %v877_v63, %v970_v19  ;;  %1374 = vst.msk [vmem:[#allocation3] sm:$0x3] %vm2131_vm5, %v970_v19  ;;  %v2332_v44 = vrot.slane %v970_v19, %v2327_v49  ;;  %v2335_v42 = vrot.slane %v970_v19, %v2329_v34 }
 0x2cc   : > { %v985_v45 = vsub.f32 %v2116_v53, %v2332_v44  ;;  %v986_v46 = vsub.f32 %v2118_v54, %v2335_v42  ;;  %v972_v47 = vmul.f32 1.442695, %v971_v30  ;;  %v987_v48 = vsub.f32 %v2120_v55, %v2332_v44  ;;  %v2910_v54 = vld [vmem:[#allocation13_spill] sm:$0xff] }
 0x2cd   : > { %v988_v59 = vsub.f32 %v2122_v56, %v2335_v42  ;;  %v989_v22 = vsub.f32 %v2124_v57, %v2332_v44  ;;  %v990_v52 = vsub.f32 %v2126_v58, %v2335_v42  ;;  %v991_v6 = vsub.f32 %v2128_v60, %v2332_v44  ;;  %v2911_v60 = vld [vmem:[#allocation14_spill] sm:$0xff] }
 0x2ce   : > { %v1049_v53 = vmul.f32 1.442695, %v985_v45  ;;  %v1051_v62 = vmul.f32 1.442695, %v986_v46  ;;  %1679 = vpow2.f32 %v972_v47  ;;  %v992_v43 = vsub.f32 %v2910_v54, %v2335_v42 }
 0x2cf   : > { %v1053_v50 = vmul.f32 1.442695, %v987_v48  ;;  %v1055_v55 = vmul.f32 1.442695, %v988_v59  ;;  %v993_v56 = vsub.f32 %v2139_v0, %v2332_v44  ;;  %v1057_v63 = vmul.f32 1.442695, %v989_v22 }
 0x2d0   : > { %1681 = vpow2.f32 %v1049_v53  ;;  %v994_v57 = vsub.f32 %v2141_v1, %v2335_v42  ;;  %v1059_v58 = vmul.f32 1.442695, %v990_v52  ;;  %v995_v14 = vsub.f32 %v2911_v60, %v2332_v44  ;;  %v2913_v48 = vld [vmem:[#allocation15_spill] sm:$0xff] }
 0x2d1   : > { %1683 = vpow2.f32 %v1051_v62  ;;  %v1061_v41 = vmul.f32 1.442695, %v991_v6  ;;  %v996_v2 = vsub.f32 %v2145_v3, %v2335_v42  ;;  %v1063_v19 = vmul.f32 1.442695, %v992_v43  ;;  %v2914_v6 = vld [vmem:[#allocation16_spill] sm:$0xff] }
 0x2d2   : > { %1685 = vpow2.f32 %v1053_v50  ;;  %v997_v0 = vsub.f32 %v2147_v4, %v2332_v44  ;;  %v1065_v30 = vmul.f32 1.442695, %v993_v56  ;;  %v998_v1 = vsub.f32 %v2149_v5, %v2335_v42 }
 0x2d3   : > { %1687 = vpow2.f32 %v1055_v55  ;;  %v1067_v45 = vmul.f32 1.442695, %v994_v57  ;;  %v2912_v46 = vmov 0.0   ;;  %v999_v59 = vsub.f32 %v2913_v48, %v2332_v44 }
 0x2d4   : > { %1689 = vpow2.f32 %v1057_v63  ;;  %v2367_v47 = vcombine.high %v2912_v46, %v2912_v46  ;;  %v1000_v3 = vsub.f32 %v2153_v7, %v2335_v42  ;;  %v1069_v22 = vmul.f32 1.442695, %v995_v14 }
 0x2d5   : > { %1691 = vpow2.f32 %v1059_v58  ;;  %v1001_v4 = vsub.f32 %v2155_v8, %v2332_v44  ;;  %v1002_v5 = vsub.f32 %v2157_v9, %v2335_v42  ;;  %v1071_v52 = vmul.f32 1.442695, %v996_v2  ;;  %v2915_v9 = vld [vmem:[#allocation17_spill] sm:$0xff]  ;;  %v2917_v58 = vld [vmem:[#allocation18_spill] sm:$0xff] }
 0x2d6   : > { %1693 = vpow2.f32 %v1061_v41  ;;  %v1003_v53 = vsub.f32 %v2914_v6, %v2332_v44  ;;  %v1004_v62 = vsub.f32 %v2161_v11, %v2335_v42  ;;  %v1073_v54 = vmul.f32 1.442695, %v997_v0  ;;  %v2919_v41 = vld [vmem:[#allocation19_spill] sm:$0xff]  ;;  %v2920_v0 = vld [vmem:[#allocation20_spill] sm:$0xff] }
 0x2d7   : > { %1695 = vpow2.f32 %v1063_v19  ;;  %v1005_v7 = vsub.f32 %v2163_v12, %v2332_v44  ;;  %v1006_v43 = vsub.f32 %v2165_v13, %v2335_v42  ;;  %v1075_v8 = vmul.f32 1.442695, %v998_v1 }
 0x2d8   : > { %1697 = vpow2.f32 %v1065_v30  ;;  %v1007_v50 = vsub.f32 %v2915_v9, %v2332_v44  ;;  %v1008_v55 = vsub.f32 %v2169_v15, %v2335_v42  ;;  %v1077_v56 = vmul.f32 1.442695, %v999_v59 }
 0x2d9   : > { %1699 = vpow2.f32 %v1067_v45  ;;  %v1009_v11 = vsub.f32 %v2171_v16, %v2332_v44  ;;  %v1010_v63 = vsub.f32 %v2173_v17, %v2335_v42  ;;  %v1079_v12 = vmul.f32 1.442695, %v1000_v3 }
 0x2da   : > { %1701 = vpow2.f32 %v1069_v22  ;;  %v1011_v13 = vsub.f32 %v2175_v18, %v2332_v44  ;;  %v1012_v60 = vsub.f32 %v2917_v58, %v2335_v42  ;;  %v1081_v15 = vmul.f32 1.442695, %v1001_v4 }
 0x2db   : > { %1703 = vpow2.f32 %v1071_v52  ;;  %v2393_v57 = vpop.eup %1679  ;;  %v1013_v16 = vsub.f32 %v2919_v41, %v2332_v44  ;;  %v1014_v17 = vsub.f32 %v2181_v21, %v2335_v42  ;;  %v1083_v2 = vmul.f32 1.442695, %v1002_v5 }
 0x2dc   : > { %2916 = vst [vmem:[#allocation13_spill] sm:$0xff] %v2393_v57  ;;  %1705 = vpow2.f32 %v1073_v54  ;;  %v1015_v18 = vsub.f32 %v2920_v0, %v2332_v44  ;;  %v1016_v30 = vsub.f32 %v2185_v23, %v2335_v42  ;;  %v1085_v1 = vmul.f32 1.442695, %v1003_v53  ;;  %v2922_v54 = vld [vmem:[#allocation21_spill] sm:$0xff] }
 0x2dd   : > { %v2399_v14 = vpop.eup %1681  ;;  %1707 = vpow2.f32 %v1075_v8  ;;  %v1017_v46 = vsub.f32 %v2187_v24, %v2332_v44  ;;  %v1018_v21 = vsub.f32 %v2189_v25, %v2335_v42  ;;  %v1087_v48 = vmul.f32 1.442695, %v1004_v62 }
 0x2de   : > { %2918 = vst [vmem:[#allocation14_spill] sm:$0xff] %v2399_v14  ;;  %v2405_v19 = vpop.eup %1683  ;;  %1709 = vpow2.f32 %v1077_v56  ;;  %v1019_v3 = vsub.f32 %v2191_v26, %v2332_v44  ;;  %v1020_v22 = vsub.f32 %v2193_v27, %v2335_v42  ;;  %v1089_v4 = vmul.f32 1.442695, %v1005_v7 }
 0x2df   : > { %v2411_v45 = vpop.eup %1685  ;;  %1711 = vpow2.f32 %v1079_v12  ;;  %v1091_v53 = vmul.f32 1.442695, %v1006_v43  ;;  %v1093_v7 = vmul.f32 1.442695, %v1007_v50  ;;  %v1095_v58 = vmul.f32 1.442695, %v1008_v55 }
 0x2e0   : > { %2921 = vst [vmem:[#allocation15_spill] sm:$0xff] %v2411_v45  ;;  %v2417_v59 = vpop.eup %1687  ;;  %1713 = vpow2.f32 %v1081_v15  ;;  %v1179_v43 = vadd.f32 %v2411_v45, %v2399_v14  ;;  %v1097_v41 = vmul.f32 1.442695, %v1009_v11  ;;  %v1103_v50 = vmul.f32 1.442695, %v1012_v60  ;;  %v2923_v55 = vld [vmem:[#allocation22_spill] sm:$0xff] }
 0x2e1   : > { %v2423_v5 = vpop.eup %1689  ;;  %1715 = vpow2.f32 %v1083_v2  ;;  %v1216_v2 = vadd.f32 %v2417_v59, %v2405_v19  ;;  %v1105_v11 = vmul.f32 1.442695, %v1013_v16  ;;  %v1109_v6 = vmul.f32 1.442695, %v1015_v18 }
 0x2e2   : > { %v2429_v62 = vpop.eup %1691  ;;  %1717 = vpow2.f32 %v1085_v1  ;;  %v1099_v1 = vmul.f32 1.442695, %v1010_v63  ;;  %v1113_v18 = vmul.f32 1.442695, %v1017_v46  ;;  %v1117_v46 = vmul.f32 1.442695, %v1019_v3 }
 0x2e3   : > { %v2435_v56 = vpop.eup %1693  ;;  %1719 = vpow2.f32 %v1087_v48  ;;  %v1180_v48 = vadd.f32 %v2423_v5, %v1179_v43  ;;  %v1217_v9 = vadd.f32 %v2429_v62, %v1216_v2  ;;  %v1107_v2 = vmul.f32 1.442695, %v1014_v17 }
 0x2e4   : > { %v2441_v15 = vpop.eup %1695  ;;  %1721 = vpow2.f32 %v1089_v4  ;;  %v1101_v4 = vmul.f32 1.442695, %v1011_v13  ;;  %v2927_v3 = vsub.f32 %v2195_v28, %v2332_v44 }
 0x2e5   : > { %v2447_v0 = vpop.eup %1697  ;;  %1723 = vpow2.f32 %v1091_v53  ;;  %v1181_v63 = vadd.f32 %v2435_v56, %v1180_v48  ;;  %v1286_v53 = vrot.slane %v2393_v57, %v2329_v34  ;;  %v1218_v13 = vadd.f32 %v2441_v15, %v1217_v9 }
 0x2e6   : > { %v2452_v12 = vpop.eup %1699  ;;  %1725 = vpow2.f32 %v1093_v7 }
 0x2e7   : > { %v2457_v8 = vpop.eup %1701  ;;  %1727 = vpow2.f32 %v1095_v58  ;;  %v1182_v60 = vadd.f32 %v2447_v0, %v1181_v63  ;;  %v2471_v58 = vmul.f32 %v2367_v47, %v1286_v53  ;;  %v1219_v16 = vadd.f32 %v2452_v12, %v1218_v13 }
 0x2e8   : > { %v2462_v43 = vpop.eup %1703  ;;  %1729 = vpow2.f32 %v1097_v41  ;;  %v1111_v47 = vmul.f32 1.442695, %v1016_v30  ;;  %v1115_v30 = vmul.f32 1.442695, %v1018_v21  ;;  %v1119_v21 = vmul.f32 1.442695, %v1020_v22 }
 0x2e9   : > { %v2467_v7 = vpop.eup %1705  ;;  %1731 = vpow2.f32 %v1099_v1  ;;  %2924 = vst [vmem:[#allocation16_spill] sm:$0xff] %v2471_v58  ;;  %v1183_v17 = vadd.f32 %v2457_v8, %v1182_v60  ;;  %v1220_v63 = vadd.f32 %v2462_v43, %v1219_v16  ;;  %v2929_v22 = vsub.f32 %v2197_v29, %v2335_v42 }
 0x2ea   : > { %v2473_v48 = vpop.eup %1707  ;;  %1733 = vpow2.f32 %v1101_v4 }
 0x2eb   : > { %v2478_v41 = vpop.eup %1709  ;;  %1735 = vpow2.f32 %v1103_v50  ;;  %v2925_v50 = vld [vmem:[#allocation23_spill] sm:$0xff]  ;;  %v1184_v13 = vadd.f32 %v2467_v7, %v1183_v17 }
 0x2ec   : > { %v2486_v1 = vpop.eup %1711  ;;  %1737 = vpow2.f32 %v1105_v11  ;;  %v1221_v11 = vadd.f32 %v2473_v48, %v1220_v63  ;;  %v1121_v63 = vmul.f32 1.442695, %v2927_v3 }
 0x2ed   : > { %v2494_v53 = vpop.eup %1713  ;;  %1739 = vpow2.f32 %v1107_v2  ;;  %v1185_v2 = vadd.f32 %v2478_v41, %v1184_v13  ;;  %v1123_v13 = vmul.f32 1.442695, %v2929_v22 }
 0x2ee   : > { %v2502_v60 = vpop.eup %1715  ;;  %1741 = vpow2.f32 %v1109_v6  ;;  %v2926_v6 = vld [vmem:[#allocation24_spill] sm:$0xff]  ;;  %v1222_v24 = vadd.f32 %v2486_v1, %v1221_v11  ;;  %v2931_v11 = vsub.f32 %v2922_v54, %v2332_v44 }
 0x2ef   : > { %v2510_v16 = vpop.eup %1717  ;;  %1743 = vpow2.f32 %v1111_v47  ;;  %v2928_v47 = vld [vmem:[#allocation25_spill] sm:$0xff]  ;;  %v1186_v23 = vadd.f32 %v2494_v53, %v1185_v2  ;;  %v2933_v2 = vsub.f32 %v2201_v31, %v2335_v42  ;;  %v2948_v31 = vld [vmem:[#allocation35_spill] sm:$0xff] }
 0x2f0   : > { %v2518_v17 = vpop.eup %1719  ;;  %1745 = vpow2.f32 %v1113_v18  ;;  %v2930_v18 = vld [vmem:[#allocation26_spill] sm:$0xff]  ;;  %v1125_v3 = vmul.f32 1.442695, %v2931_v11  ;;  %v1223_v4 = vadd.f32 %v2502_v60, %v1222_v24  ;;  %v2935_v24 = vsub.f32 %v2203_v32, %v2332_v44 }
 0x2f1   : > { %v2526_v25 = vpop.eup %1721  ;;  %1747 = vpow2.f32 %v1115_v30  ;;  %v2932_v30 = vld [vmem:[#allocation27_spill] sm:$0xff]  ;;  %v1127_v22 = vmul.f32 1.442695, %v2933_v2  ;;  %v1187_v9 = vadd.f32 %v2510_v16, %v1186_v23  ;;  %v2937_v23 = vsub.f32 %v2205_v33, %v2335_v42 }
 0x2f2   : > { %v2534_v26 = vpop.eup %1723  ;;  %1749 = vpow2.f32 %v1117_v46  ;;  %v2934_v46 = vld [vmem:[#allocation28_spill] sm:$0xff]  ;;  %v1129_v11 = vmul.f32 1.442695, %v2935_v24  ;;  %v1224_v52 = vadd.f32 %v2518_v17, %v1223_v4  ;;  %v2939_v32 = vsub.f32 %v2923_v55, %v2332_v44 }
 0x2f3   : > { %v2542_v27 = vpop.eup %1725  ;;  %1751 = vpow2.f32 %v1119_v21  ;;  %v2936_v21 = vld [vmem:[#allocation29_spill] sm:$0xff]  ;;  %v1131_v2 = vmul.f32 1.442695, %v2937_v23  ;;  %v1188_v58 = vadd.f32 %v2526_v25, %v1187_v9  ;;  %v2941_v33 = vsub.f32 %v2209_v35, %v2335_v42 }
 0x2f4   : > { %v2550_v28 = vpop.eup %1727  ;;  %1753 = vpow2.f32 %v1121_v63  ;;  %v2938_v63 = vld [vmem:[#allocation30_spill] sm:$0xff]  ;;  %v1133_v4 = vmul.f32 1.442695, %v2939_v32  ;;  %v1225_v24 = vadd.f32 %v2534_v26, %v1224_v52  ;;  %v2943_v52 = vsub.f32 %v2211_v36, %v2332_v44 }
 0x2f5   : > { %v2558_v29 = vpop.eup %1729  ;;  %1755 = vpow2.f32 %v1123_v13  ;;  %v2940_v13 = vld [vmem:[#allocation31_spill] sm:$0xff]  ;;  %v1135_v9 = vmul.f32 1.442695, %v2941_v33  ;;  %v1189_v23 = vadd.f32 %v2542_v27, %v1188_v58  ;;  %v2945_v35 = vsub.f32 %v2213_v37, %v2335_v42 }
 0x2f6   : > { %v1732_v54 = vpop.eup %1731  ;;  %1757 = vpow2.f32 %v1125_v3  ;;  %v2942_v3 = vld [vmem:[#allocation32_spill] sm:$0xff]  ;;  %v1137_v55 = vmul.f32 1.442695, %v2943_v52  ;;  %v1226_v32 = vadd.f32 %v2550_v28, %v1225_v24  ;;  %v2947_v36 = vsub.f32 %v2925_v50, %v2332_v44 }
 0x2f7   : > { %v2572_v49 = vpop.eup %1733  ;;  %1759 = vpow2.f32 %v1127_v22  ;;  %v2944_v22 = vld [vmem:[#allocation33_spill] sm:$0xff]  ;;  %v1139_v58 = vmul.f32 1.442695, %v2945_v35  ;;  %v1190_v33 = vadd.f32 %v2558_v29, %v1189_v23  ;;  %v2949_v37 = vsub.f32 %v2217_v39, %v2335_v42 }
 0x2f8   : > { %v1736_v34 = vpop.eup %1735  ;;  %1761 = vpow2.f32 %v1129_v11  ;;  %v2946_v11 = vld [vmem:[#allocation34_spill] sm:$0xff]  ;;  %v1141_v24 = vmul.f32 1.442695, %v2947_v36  ;;  %v1227_v52 = vadd.f32 %v1732_v54, %v1226_v32 }
 0x2f9   : > { %v1738_v61 = vpop.eup %1737  ;;  %1763 = vpow2.f32 %v1131_v2  ;;  %v1143_v35 = vmul.f32 1.442695, %v2949_v37  ;;  %v1191_v23 = vadd.f32 %v2572_v49, %v1190_v33 }
 0x2fa   : > { %v1740_v57 = vpop.eup %1739  ;;  %1765 = vpow2.f32 %v1133_v4  ;;  %v2950_v4 = vsub.f32 %v2219_v40, %v2332_v44  ;;  %v1228_v50 = vadd.f32 %v1736_v34, %v1227_v52  ;;  %v2952_v40 = vsub.f32 %v2928_v47, %v2332_v44 }
 0x2fb   : > { %v1742_v20 = vpop.eup %1741  ;;  %1767 = vpow2.f32 %v1135_v9  ;;  %v2951_v9 = vsub.f32 %v2926_v6, %v2335_v42  ;;  %v1192_v45 = vadd.f32 %v1738_v61, %v1191_v23  ;;  %v2953_v6 = vsub.f32 %v2930_v18, %v2335_v42 }
 0x2fc   : > { %v1744_v14 = vpop.eup %1743  ;;  %1769 = vpow2.f32 %v1137_v55  ;;  %v1145_v51 = vmul.f32 1.442695, %v2950_v4  ;;  %v1308_v36 = vpack.c.bf16 %v1742_v20, %v1738_v61  ;;  %v1046_v55 = vsub.f32 %v2302_v38, %v2335_v42 }
 0x2fd   : > { %v2606_v32 = vpop.eup %1745  ;;  %1771 = vpow2.f32 %v1139_v58  ;;  %v1147_v2 = vmul.f32 1.442695, %v2951_v9  ;;  %v1309_v39 = vpack.c.bf16 %v1744_v14, %v1740_v57  ;;  %v1149_v33 = vmul.f32 1.442695, %v2952_v40 }
 0x2fe   : > { %v2611_v37 = vpop.eup %1747  ;;  %1773 = vpow2.f32 %v1141_v24  ;;  %v1229_v52 = vadd.f32 %v1740_v57, %v1228_v50  ;;  %v1151_v58 = vmul.f32 1.442695, %v2953_v6  ;;  %v1193_v61 = vadd.f32 %v1742_v20, %v1192_v45 }
 0x2ff   : > { %v2618_v4 = vpop.eup %1749  ;;  %1775 = vpow2.f32 %v1143_v35  ;;  %1326 = vmatprep.subr.bf16.mxu1 %v1309_v39  ;;  %v1307_v23 = vpack.c.bf16 %v1736_v34, %v1732_v54  ;;  %v2954_v38 = vsub.f32 %v2932_v30, %v2332_v44  ;;  %v2955_v20 = vsub.f32 %v2934_v46, %v2335_v42 }
 0x300   : > { %v2623_v9 = vpop.eup %1751  ;;  %1777 = vpow2.f32 %v1145_v51  ;;  %v1230_v47 = vadd.f32 %v1744_v14, %v1229_v52  ;;  %1327 = vmatpush1.bf16.msra.mxu1 %v1308_v36  ;;  %v1310_v57 = vpack.c.bf16 %v2618_v4, %v2606_v32  ;;  %v1194_v34 = vadd.f32 %v2606_v32, %v1193_v61 }
 0x301   : > { %v1153_v24 = vmul.f32 1.442695, %v2954_v38  ;;  %v2630_v35 = vpop.eup %1753  ;;  %1779 = vpow2.f32 %v1147_v2  ;;  %v1155_v45 = vmul.f32 1.442695, %v2955_v20  ;;  %1328 = vmatprep.subr.bf16.mxu1 %v1307_v23  ;;  %v1311_v51 = vpack.c.bf16 %v2623_v9, %v2611_v37 }
 0x302   : > { %v2638_v18 = vpop.eup %1755  ;;  %1781 = vpow2.f32 %v1149_v33  ;;  %v2956_v14 = vsub.f32 %v2936_v21, %v2332_v44  ;;  %v1231_v54 = vadd.f32 %v2611_v37, %v1230_v47  ;;  %v1306_v2 = vpack.c.bf16 %v2572_v49, %v2558_v29  ;;  %v2958_v21 = vld [vmem:[#allocation36_spill] sm:$0xff] }
 0x303   : > { %v2646_v46 = vpop.eup %1757  ;;  %1783 = vpow2.f32 %v1151_v58  ;;  %v2957_v50 = vsub.f32 %v2938_v63, %v2335_v42  ;;  %v1195_v39 = vadd.f32 %v2618_v4, %v1194_v34  ;;  %v1305_v40 = vpack.c.bf16 %v2550_v28, %v2534_v26 }
 0x304   : > { %v1157_v30 = vmul.f32 1.442695, %v2956_v14  ;;  %v2654_v33 = vpop.eup %1759  ;;  %v1047_v52 = vsub.f32 %v2958_v21, %v2332_v44  ;;  %1785 = vpow2.f32 %v1153_v24  ;;  %v2959_v49 = vsub.f32 %v2940_v13, %v2332_v44  ;;  %1329 = vmatpush1.bf16.msra.mxu1 %v1306_v2 }
 0x305   : > { %v1159_v36 = vmul.f32 1.442695, %v2957_v50  ;;  %v1232_v6 = vadd.f32 %v2623_v9, %v1231_v54  ;;  %v2662_v63 = vpop.eup %1761  ;;  %v1048_v58 = vsub.f32 %v2314_v10, %v2335_v42  ;;  %1787 = vpow2.f32 %v1155_v45  ;;  %1330 = vmatprep.subr.bf16.mxu1 %v1305_v40 }
 0x306   : > { %v1161_v29 = vmul.f32 1.442695, %v2959_v49  ;;  %v2960_v26 = vsub.f32 %v2942_v3, %v2335_v42  ;;  %v1196_v61 = vadd.f32 %v2630_v35, %v1195_v39  ;;  %v2670_v23 = vpop.eup %1763  ;;  %1789 = vpow2.f32 %v1157_v30 }
 0x307   : > { %v2961_v13 = vsub.f32 %v2944_v22, %v2332_v44  ;;  %v1233_v24 = vadd.f32 %v2638_v18, %v1232_v6  ;;  %v1304_v10 = vpack.c.bf16 %v2542_v27, %v2526_v25  ;;  %v2678_v47 = vpop.eup %1765  ;;  %1791 = vpow2.f32 %v1159_v36 }
 0x308   : > { %v1163_v28 = vmul.f32 1.442695, %v2960_v26  ;;  %v2962_v3 = vsub.f32 %v2946_v11, %v2335_v42  ;;  %v1197_v45 = vadd.f32 %v2646_v46, %v1196_v61  ;;  %v1303_v34 = vpack.c.bf16 %v2518_v17, %v2502_v60  ;;  %v2686_v14 = vpop.eup %1767 }
 0x309   : > { %v1165_v38 = vmul.f32 1.442695, %v2961_v13  ;;  %1793 = vpow2.f32 %v1161_v29  ;;  %v2963_v22 = vsub.f32 %v2948_v31, %v2332_v44  ;;  %v1234_v25 = vadd.f32 %v2654_v33, %v1233_v24  ;;  %1331 = vmatpush1.bf16.msra.mxu1 %v1304_v10  ;;  %v2692_v27 = vpop.eup %1769 }
 0x30a   : > { %v1167_v20 = vmul.f32 1.442695, %v2962_v3  ;;  %1795 = vpow2.f32 %v1163_v28  ;;  %v1171_v42 = vmul.f32 1.442695, %v1046_v55  ;;  %v1198_v11 = vadd.f32 %v2662_v63, %v1197_v45  ;;  %1332 = vmatprep.subr.bf16.mxu1 %v1303_v34  ;;  %v2695_v54 = vpop.eup %1771 }
 0x30b   : > { %v1169_v30 = vmul.f32 1.442695, %v2963_v22  ;;  %1797 = vpow2.f32 %v1165_v38  ;;  %v1173_v60 = vmul.f32 1.442695, %v1047_v52  ;;  %v1235_v17 = vadd.f32 %v2670_v23, %v1234_v25  ;;  %v2700_v31 = vpop.eup %1773 }
 0x30c   : > { %v1302_v44 = vpack.c.bf16 %v2510_v16, %v2494_v53  ;;  %1799 = vpow2.f32 %v1167_v20  ;;  %v1175_v2 = vmul.f32 1.442695, %v1048_v58  ;;  %v1199_v50 = vadd.f32 %v2678_v47, %v1198_v11  ;;  %v2705_v36 = vpop.eup %1775 }
 0x30d   : > { %v1301_v55 = vpack.c.bf16 %v2486_v1, %v2473_v48  ;;  %1801 = vpow2.f32 %v1169_v30  ;;  %v1236_v39 = vadd.f32 %v2686_v14, %v1235_v17  ;;  %v2708_v40 = vpop.eup %1777  ;;  %v1300_v48 = vpack.c.bf16 %v2478_v41, %v2467_v7 }
 0x30e   : > { %1333 = vmatpush1.bf16.msra.mxu1 %v1302_v44  ;;  %1803 = vpow2.f32 %v1171_v42  ;;  %v1200_v53 = vadd.f32 %v2692_v27, %v1199_v50  ;;  %v2711_v16 = vpop.eup %1779  ;;  %v1299_v49 = vpack.c.bf16 %v2462_v43, %v2452_v12  ;;  %v1298_v7 = vpack.c.bf16 %v2457_v8, %v2447_v0 }
 0x30f   : > { %1334 = vmatprep.subr.bf16.mxu1 %v1301_v55  ;;  %1805 = vpow2.f32 %v1173_v60  ;;  %v1237_v21 = vadd.f32 %v2695_v54, %v1236_v39  ;;  %v2716_v1 = vpop.eup %1781  ;;  %v1297_v12 = vpack.c.bf16 %v2441_v15, %v2429_v62  ;;  %v1296_v22 = vpack.c.bf16 %v2435_v56, %v2423_v5  ;;  %v2965_v5 = vld [vmem:[#allocation15_spill] sm:$0xff]  ;;  %v2966_v56 = vld [vmem:[#allocation14_spill] sm:$0xff] }
 0x310   : > { %1807 = vpow2.f32 %v1175_v2  ;;  %v1201_v52 = vadd.f32 %v2700_v31, %v1200_v53  ;;  %v1784_v29 = vpop.eup %1783  ;;  %v2964_v11 = vpack.c.bf16 %v2417_v59, %v2405_v19  ;;  %v2967_v53 = vpack.c.bf16 %v2965_v5, %v2966_v56 }
 0x311   : > { %v1238_v6 = vadd.f32 %v2705_v36, %v1237_v21  ;;  %v1786_v58 = vpop.eup %1785 }
 0x312   : > { %1335 = vmatpush1.bf16.msra.mxu1 %v1300_v48  ;;  %v1202_v26 = vadd.f32 %v2708_v40, %v1201_v52  ;;  %v1788_v28 = vpop.eup %1787 }
 0x313   : > { %1336 = vmatprep.subr.bf16.mxu1 %v1299_v49  ;;  %v1239_v61 = vadd.f32 %v2711_v16, %v1238_v6  ;;  %v1790_v41 = vpop.eup %1789 }
 0x314   : > { %v1203_v13 = vadd.f32 %v2716_v1, %v1202_v26  ;;  %v1792_v43 = vpop.eup %1791  ;;  %v1320_v24 = vpack.c.bf16 %v1790_v41, %v1786_v58 }
 0x315   : > { %v1240_v38 = vadd.f32 %v1784_v29, %v1239_v61  ;;  %v1321_v20 = vpack.c.bf16 %v1792_v43, %v1788_v28 }
 0x316   : > { %1337 = vmatpush1.bf16.msra.mxu1 %v1298_v7  ;;  %v1794_v10 = vpop.eup %1793  ;;  %v1204_v3 = vadd.f32 %v1786_v58, %v1203_v13  ;;  %v1319_v13 = vpack.c.bf16 %v1784_v29, %v2711_v16  ;;  %v1315_v16 = vpack.c.bf16 %v2686_v14, %v2670_v23  ;;  %v1177_v29 = vld [vmem:[#allocation4] sm:$0x3]  ;;  %v1312_v23 = vpack.c.bf16 %v2646_v46, %v2630_v35  ;;  %v2972_v35 = vld [vmem:[#allocation39_spill] sm:$0xff] }
 0x317   : > { %1338 = vmatprep.subr.bf16.mxu1 %v1297_v12  ;;  %v1796_v45 = vpop.eup %1795  ;;  %v1241_v34 = vadd.f32 %v1788_v28, %v1240_v38 }
 0x318   : > { %v1798_v8 = vpop.eup %1797  ;;  %v1205_v0 = vadd.f32 %v1790_v41, %v1204_v3 }
 0x319   : > { %v1800_v30 = vpop.eup %1799  ;;  %v1242_v25 = vadd.f32 %v1792_v43, %v1241_v34  ;;  %v1322_v42 = vpack.c.bf16 %v1798_v8, %v1794_v10 }
 0x31a   : > { %1339 = vmatpush1.bf16.msra.mxu1 %v1296_v22  ;;  %v1802_v62 = vpop.eup %1801  ;;  %v1206_v15 = vadd.f32 %v1794_v10, %v1205_v0  ;;  %v1323_v60 = vpack.c.bf16 %v1800_v30, %v1796_v45  ;;  %v1318_v10 = vpack.c.bf16 %v2716_v1, %v2708_v40  ;;  %v1316_v22 = vpack.c.bf16 %v2700_v31, %v2692_v27  ;;  %v2969_v1 = vld [vmem:[#allocation13_spill] sm:$0xff] }
 0x31b   : > { %1340 = vmatprep.subr.bf16.mxu1 %v2964_v11  ;;  %v1804_v17 = vpop.eup %1803  ;;  %v1243_v44 = vadd.f32 %v1796_v45, %v1242_v25  ;;  %v1317_v45 = vpack.c.bf16 %v2705_v36, %v2695_v54  ;;  %v1314_v40 = vpack.c.bf16 %v2678_v47, %v2662_v63  ;;  %v1178_v54 = vmul.f32 %v2969_v1, %v1177_v29  ;;  %v1393_v11 = vld [vmem:[%s337_s24] sm:$0xff] }
 0x31c   : > { %v1806_v2 = vpop.eup %1805  ;;  %v1207_v50 = vadd.f32 %v1798_v8, %v1206_v15  ;;  %v1313_v0 = vpack.c.bf16 %v2654_v33, %v2638_v18  ;;  %v2971_v18 = vld [vmem:[#allocation37_spill] sm:$0xff]  ;;  %v1282_v46 = vrot.slane %v2969_v1, %v2972_v35 }
 0x31d   : > { %v1808_v55 = vpop.eup %1807  ;;  %v1244_v39 = vadd.f32 %v1800_v30, %v1243_v44  ;;  %v1324_v21 = vpack.c.bf16 %v1806_v2, %v1802_v62  ;;  %v577_v33 = vpack.c.bf16 %v2971_v18, %v2971_v18 }
 0x31e   : > { %1341 = vmatpush1.bf16.msra.mxu1 %v2967_v53  ;;  %v1208_v48 = vadd.f32 %v1802_v62, %v1207_v50  ;;  %v1325_v52 = vpack.c.bf16 %v1808_v55, %v1804_v17  ;;  %v1292_v37 = vmul.f32 0.0, %v1282_v46 }
 0x31f   : > { %v1245_v49 = vadd.f32 %v1804_v17, %v1244_v39 }
 0x320   : > { %v1209_v6 = vadd.f32 %v1806_v2, %v1208_v48  ;;  %1342 = vmatprep.subr.bf16.mxu1 %v1325_v52 }
 0x321   : > { %v1246_v58 = vadd.f32 %v1808_v55, %v1245_v49 }
 0x322   : > { %1343 = vmatpush2.bf16.msra.mxu1 %v1324_v21  ;;  %v1210_v19 = vrot.slane %v1209_v6, 4 }
 0x323   : > { %1344 = vmatprep.subr.bf16.mxu1 %v1323_v60  ;;  %v1247_v59 = vrot.slane %v1246_v58, 4 }
 0x324   : > { %v1211_v26 = vadd.f32 %v1210_v19, %v1209_v6 }
 0x325   : > { %v1248_v28 = vadd.f32 %v1247_v59, %v1246_v58 }
 0x326   : > { %1345 = vmatpush2.bf16.msra.mxu1 %v1322_v42  ;;  %v1212_v61 = vrot.slane %v1211_v26, 2 }
 0x327   : > { %1346 = vmatprep.subr.bf16.mxu1 %v1321_v20  ;;  %v1249_v7 = vrot.slane %v1248_v28, 2 }
 0x328   : > { %v1213_v41 = vadd.f32 %v1212_v61, %v1211_v26 }
 0x329   : > { %v1250_v12 = vadd.f32 %v1249_v7, %v1248_v28 }
 0x32a   : > { %1347 = vmatpush2.bf16.msra.mxu1 %v1320_v24  ;;  %v1214_v43 = vrot.slane %v1213_v41, 1  ;;  %v2968_v24 = vld [vmem:[#allocation38_spill] sm:$0xff] }
 0x32b   : > { %1348 = vmatprep.subr.bf16.mxu1 %v1319_v13  ;;  %v1251_v38 = vrot.slane %v1250_v12, 1 }
 0x32c   : > { %v1215_v3 = vadd.f32 %v1214_v43, %v1213_v41 }
 0x32d   : > { %v1252_v34 = vadd.f32 %v1251_v38, %v1250_v12 }
 0x32e   : > { %1349 = vmatpush2.bf16.msra.mxu1 %v1318_v10 }
 0x32f   : > { %1350 = vmatprep.subr.bf16.mxu1 %v1317_v45  ;;  %v1255_v20 = vcombine.low %v1215_v3, %v1252_v34 }
 0x331   : > { %v1262_v8 = vrot.slane %v1255_v20, %v2968_v24 }
 0x332   : > { %1351 = vmatpush2.bf16.msra.mxu1 %v1316_v22 }
 0x333   : > { %1352 = vmatprep.subr.bf16.mxu1 %v1315_v16  ;;  %v1269_v36 = vrot.slane %v1262_v8, %v2968_v24 }
 0x335   : > { %v1271_v27 = vadd.f32 %v1269_v36, %v1178_v54 }
 0x336   : > { %1353 = vmatpush2.bf16.msra.mxu1 %v1314_v40 }
 0x337   : > { %1354 = vmatprep.subr.bf16.mxu1 %v1313_v0  ;;  %1276 = vst.msk [vmem:[#allocation4] sm:$0x3] %vm2131_vm5, %v1271_v27 }
 0x33a   : > { %1355 = vmatpush2.bf16.msra.mxu1 %v1312_v23 }
 0x33b   : > { %1356 = vmatprep.subr.bf16.mxu1 %v1311_v51  ;;  %v2973_v51 = vld [vmem:[#allocation40_spill] sm:$0xff] }
 0x33e   : > { %1357 = vmatpush2.bf16.msra.mxu1 %v1310_v57  ;;  %v1378_v63 = vld [vmem:[#allocation4] sm:$0x3] }
 0x33f   : > { %1809 = vrcp.f32 %v1378_v63  ;;  %v2974_v57 = vld [vmem:[#allocation16_spill] sm:$0xff] }
 0x341   : > { %1359 = vmatmul.mubr.bf16.vlgmr.msra.gmra.mxu1 %v577_v33 }
 0x34c   : > { %v1810_v47 = vpop.eup %1809 }
 0x34d   : > { %v1385_v9 = vrot.slane %v1810_v47, %v2972_v35  ;;  %v1389_v30 = vrot.slane %v1810_v47, %v2973_v51 }
 0x34f   : > { %v1390_v15 = vcombine.low %v1385_v9, %v1389_v30 }
 0x401   : > { %v1360_v31 = vpop.f32.mrf.mxu1 }
 0x402   : > { %v1367_v4 = vadd.f32 %v1360_v31, %v1292_v37 }
 0x403   : > { %v1362_v32 = vpop.f32.mrf.mxu1 }
 0x404   : > { %v1368_v25 = vadd.f32 %v1362_v32, %v2974_v57 }
 0x405   : > { %v1364_v42 = vpop.f32.mrf.mxu1 }
 0x406   : > { %v1371_v62 = vcombine.low %v1367_v4, %v1368_v25 }
 0x407   : > { %v1365_v60 = vpop.f32.mrf.mxu1 }
 0x408   : > { %v1392_v17 = vmul.f32 %v1390_v15, %v1371_v62 }
 0x40a   : > { %v1394_v44 = vadd.f32 %v1393_v11, %v1392_v17 }
 0x40c   : > { %1395 = vst [vmem:[%s317_s27] sm:$0xff] %v1394_v44 }
 0x40d   : > { %1852 = shalt.err (!%p1849_p5)
}
 0x40e   : > { %s1853_s16 = scalar_lea.hbm %s1411_s9, 128  ;;  %s1857_s17 = scalar_lea.hbm %s2821_s5, 256 }
 0x40f   : > { %p1854_p6 = scmp.ne.s32.totalorder %s1411_s9, %s1853_s16  ;;  %p1858_p4 = scmp.lt.s32.totalorder %s1411_s9, %s2821_s5 }
 0x410   : > { %p1859_p13 = scmp.lt.s32.totalorder %s1857_s17, %s1853_s16 }
 0x411   : > { %p1855_p7 = pnand %p1854_p6, %p2008_p9 }
 0x412   : > { %p1860_p12 = por %p1859_p13, %p1858_p4 }
 0x413   : > { %p1856_p10 = pneg %p1855_p7 }
 0x415   : > { %p1861_p8 = pnand %p1860_p12, %p1856_p10 }
 0x417   : > { %1864 = shalt.err (!%p1861_p8)
}
 0x418   : > { %1608 = dma.vmem_to_hbm [thread:$0]  (%p2008_p9), %s1414_s29, 128, %s1411_s9, %s1397_s14  }
 0x419 PF: > { %s1425_s27 = sand.u32 1, %s1899_s18   ;;  %p2975_p11 = scmp.ne.s32.totalorder %s2876_s8, 0 }
 0x41a   : > { %p2976_p0 = scmp.ge.s32.totalorder %s1919_s23, 2  ;;  %s1426_s10 = scalar_lea.sflag [#allocation8], %s1425_s27 }
 0x41c   : > { %p1615_p1 = pnand %p2976_p0, %p2975_p11 }
 0x41e   : > { %p1616_p2 = pneg %p1615_p1 }
 0x420   : > { %1894 = dma.done.wait (%p1616_p2), %s1426_s10, 128  }
 0x421   : > { %1896 = vsyncadd (%p1616_p2), %s1426_s10, 4294967168  ;;  %s21_s23 = sadd.s32 1, %s1919_s23   ;;  %s2977_s18 = smov %s1903_s19 }
 0x422   : > { %p18_p3 = scmp.ge.s32.totalorder %s21_s23, 4   ;;  %s2978_s19 = smov %s1907_s20 }
 0x423   : > { %s2979_s20 = smov %s2013_s7  ;;  %s2980_s21 = smov %s1915_s22 }
 0x424   : > { %s2981_s22 = smov %s2983_s26  ;;  %20 = sbr.rel (!%p18_p3) target bundleno = 6 (0x6), region = 99 }
 0x429   :  { %1431 = vsyncpa [#allocation7], 1 }
 0x42a   :  { %1433 = vsyncpa [#allocation7 + $0x1], 1 }
 0x42b   :  { %1434 = vsyncpa [#allocation8], 1 }
 0x42c   :  { %1436 = vsyncpa [#allocation8 + $0x1], 1 }

</bundles_post_ra>
